<compile_context>
chip_gen: v7x
topology: tpu7x:2x2x1
jax: 0.10.0
libtpu: 0.0.40
codegen_flags: <defaults>
</compile_context>

<pallas_src>
import functools

import jax
import jax.numpy as jnp
from jax.experimental import pallas as pl
from jax.experimental.pallas import tpu as pltpu


def _rup(x, m):
    return ((x + m - 1) // m) * m


def _choose_tm(M):
    """Pick a row tile: >=2 blocks when possible (megacore), multiple of 8,
    capped at 256; otherwise a single block covering the full dim."""
    for tm in (256, 128, 64, 32, 16, 8):
        if M % tm == 0 and M // tm >= 2:
            return tm
    return M


# ---------------------------------------------------------------------------
# Pallas kernels
# ---------------------------------------------------------------------------
def _mm_bias_act_kernel(x_ref, w_ref, b_ref, o_ref, *, out_act):
    # x, w are bf16 tiles; accumulate in f32 on the MXU.
    acc = jnp.dot(x_ref[...], w_ref[...], preferred_element_type=jnp.float32)
    acc = acc + b_ref[...]                       # bias broadcast over rows (f32)
    if out_act == "tanh":
        acc = jnp.tanh(acc)
    o_ref[...] = acc


def matmul_bias_act(x, w, b, out_act=None):
    """x:(M,Kp) bf16 @ w:(Kp,Np) bf16 + b:(1,Np) f32 -> (M,Np) f32."""
    M, Kp = x.shape
    Kp2, Np = w.shape
    assert Kp == Kp2 and Kp % 128 == 0 and Np % 128 == 0
    tm = _choose_tm(M)
    kernel = functools.partial(_mm_bias_act_kernel, out_act=out_act)
    return pl.pallas_call(
        kernel,
        out_shape=jax.ShapeDtypeStruct((M, Np), jnp.float32),
        grid=(M // tm,),
        in_specs=[
            pl.BlockSpec((tm, Kp), lambda i: (i, 0)),
            pl.BlockSpec((Kp, Np), lambda i: (0, 0)),
            pl.BlockSpec((1, Np), lambda i: (0, 0)),
        ],
        out_specs=pl.BlockSpec((tm, Np), lambda i: (i, 0)),
        compiler_params=pltpu.CompilerParams(dimension_semantics=("parallel",)),
    )(x, w, b)


def batched_matmul_bias_act(x, w, b, out_act=None):
    """x:(G,M,Kp) bf16, w:(G,Kp,Np) bf16, b:(1,Np) f32 -> (G,M,Np) f32.
    One pallas_call for all G sub-problems (leading grid axis selects the
    per-parity weight block)."""
    G, M, Kp = x.shape
    G2, Kp2, Np = w.shape
    assert G == G2 and Kp == Kp2 and Kp % 128 == 0 and Np % 128 == 0
    tm = _choose_tm(M)
    kernel = functools.partial(_mm_bias_act_kernel, out_act=out_act)
    return pl.pallas_call(
        kernel,
        out_shape=jax.ShapeDtypeStruct((G, M, Np), jnp.float32),
        grid=(G, M // tm),
        in_specs=[
            pl.BlockSpec((None, tm, Kp), lambda g, i: (g, i, 0)),
            pl.BlockSpec((None, Kp, Np), lambda g, i: (g, 0, 0)),
            pl.BlockSpec((1, Np), lambda g, i: (0, 0)),
        ],
        out_specs=pl.BlockSpec((None, tm, Np), lambda g, i: (g, i, 0)),
        compiler_params=pltpu.CompilerParams(
            dimension_semantics=("parallel", "parallel")),
    )(x, w, b)


def _innermost_fused_kernel(x_ref, wd_ref, bd_ref, wu_ref, bu_ref, o_ref):
    # down-conv (as matmul) + bias + ReLU + up-conv (1x1 -> 2x2) + bias,
    # all in one kernel (one launch for the innermost U-Net block).
    d = jnp.dot(x_ref[...], wd_ref[...], preferred_element_type=jnp.float32)
    d = jnp.maximum(d + bd_ref[...], 0.0)                       # uprelu
    u = jnp.dot(d.astype(jnp.bfloat16), wu_ref[...],
                preferred_element_type=jnp.float32)
    o_ref[...] = u + bu_ref[...]


def innermost_fused(patches, p):
    """patches:(M,Kd) bf16 -> (M, Nup) f32 with Nup covering the 2x2 up output."""
    M, Kd = patches.shape
    wd, bd, wu, bu = p["wd_mat"], p["bd_vec"], p["wu_fused"], p["bu_fused"]
    Ndp = wd.shape[1]
    Nup = wu.shape[1]
    return pl.pallas_call(
        _innermost_fused_kernel,
        out_shape=jax.ShapeDtypeStruct((M, Nup), jnp.float32),
        grid=(1,),
        in_specs=[
            pl.BlockSpec((M, Kd), lambda i: (0, 0)),
            pl.BlockSpec((Kd, Ndp), lambda i: (0, 0)),
            pl.BlockSpec((1, Ndp), lambda i: (0, 0)),
            pl.BlockSpec((Ndp, Nup), lambda i: (0, 0)),
            pl.BlockSpec((1, Nup), lambda i: (0, 0)),
        ],
        out_specs=pl.BlockSpec((M, Nup), lambda i: (0, 0)),
    )(patches, wd, bd, wu, bu)


# ---------------------------------------------------------------------------
# Layout glue (JAX): NHWC im2col for the strided conv and the parity-decomposed
# transposed conv.  Patches are emitted in bf16.
# ---------------------------------------------------------------------------
def _im2col_down(x, k_pad):
    """x:(N,H,W,C) f32 -> ((N*Ho*Wo, k_pad) bf16, Ho, Wo) for Conv2d(k=4,s=2,p=1).
    Column order (kh, kw, c), c fastest; zero-padded to k_pad columns."""
    N, H, W, C = x.shape
    Ho, Wo = H // 2, W // 2
    xp = jnp.pad(x, ((0, 0), (1, 1), (1, 1), (0, 0)))
    cols = [xp[:, kh:kh + 2 * Ho:2, kw:kw + 2 * Wo:2, :]
            for kh in range(4) for kw in range(4)]
    p = jnp.concatenate(cols, axis=-1).reshape(N * Ho * Wo, 16 * C)
    p = p.astype(jnp.bfloat16)
    if 16 * C < k_pad:
        p = jnp.concatenate(
            [p, jnp.zeros((p.shape[0], k_pad - 16 * C), jnp.bfloat16)], axis=-1)
    return p, Ho, Wo


def _im2col_up_parity(x, k_pad):
    """x:(N,H,W,C) f32 -> (4, N*H*W, k_pad) bf16: one 2x2-window patch slab per
    output parity (a,b) of ConvTranspose2d(k=4,s=2,p=1). Column order (dh,dw,c)."""
    N, H, W, C = x.shape
    xp = jnp.pad(x, ((0, 0), (1, 1), (1, 1), (0, 0)))
    slabs = []
    for a in range(2):
        for b in range(2):
            cols = [xp[:, a + dh:a + dh + H, b + dw:b + dw + W, :]
                    for dh in range(2) for dw in range(2)]
            slabs.append(jnp.concatenate(cols, axis=-1).reshape(N * H * W, 4 * C))
    p = jnp.stack(slabs, axis=0).astype(jnp.bfloat16)
    if 4 * C < k_pad:
        p = jnp.concatenate(
            [p, jnp.zeros((4, p.shape[1], k_pad - 4 * C), jnp.bfloat16)], axis=-1)
    return p


def down_conv(x, p):
    """PyTorch Conv2d(k=4, s=2, p=1) in NHWC."""
    N = x.shape[0]
    cout = p["down_cout"]
    patches, Ho, Wo = _im2col_down(x, p["wd_mat"].shape[0])
    out = matmul_bias_act(patches, p["wd_mat"], p["bd_vec"])
    return out[:, :cout].reshape(N, Ho, Wo, cout)


def up_conv(x, p, out_act=None):
    """PyTorch ConvTranspose2d(k=4, s=2, p=1) in NHWC via 4-way output-parity
    decomposition (no dilation zeros -> 4x fewer MACs)."""
    N, H, W, _ = x.shape
    cout = p["up_cout"]
    patches = _im2col_up_parity(x, p["wu_par"].shape[1])
    out = batched_matmul_bias_act(patches, p["wu_par"], p["bu_vec"], out_act=out_act)
    out = out[:, :, :cout].reshape(2, 2, N, H, W, cout)      # [a, b, n, h, w, c]
    out = out.transpose(2, 3, 0, 4, 1, 5).reshape(N, 2 * H, 2 * W, cout)
    return out


# ---------------------------------------------------------------------------
# Parameters: PyTorch layouts -> Pallas-ready padded bf16 matrices (done once).
# ---------------------------------------------------------------------------
def build_unet_specs(input_nc, output_nc, ngf, num_downs):
    assert input_nc == output_nc
    specs = [(ngf * 8, ngf * 8, False, True)]                 # innermost first
    for _ in range(num_downs - 5):
        specs.append((ngf * 8, ngf * 8, False, False))
    specs.append((ngf * 4, ngf * 8, False, False))
    specs.append((ngf * 2, ngf * 4, False, False))
    specs.append((ngf, ngf * 2, False, False))
    specs.append((output_nc, ngf, True, False))               # outermost last
    return specs


def build_unet_params(key, specs):
    """Random weights in PyTorch layouts:
       down_w: (inner_nc, outer_nc, 4, 4)  for Conv2d(outer_nc -> inner_nc)
       up_w:   (up_in,   outer_nc, 4, 4)   for ConvTranspose2d(up_in -> outer_nc)."""
    params = []
    for (outer_nc, inner_nc, outermost, innermost) in specs:
        key, k1, k2, k3, k4 = jax.random.split(key, 5)
        up_in = inner_nc if innermost else inner_nc * 2
        params.append(dict(
            down_w=0.02 * jax.random.normal(k1, (inner_nc, outer_nc, 4, 4), jnp.float32),
            down_b=0.02 * jax.random.normal(k2, (inner_nc,), jnp.float32),
            up_w=0.02 * jax.random.normal(k3, (up_in, outer_nc, 4, 4), jnp.float32),
            up_b=0.02 * jax.random.normal(k4, (outer_nc,), jnp.float32),
        ))
    return params


def _pad2(m, rows, cols, dtype):
    out = jnp.zeros((rows, cols), dtype)
    return out.at[:m.shape[0], :m.shape[1]].set(m.astype(dtype))


def prepare_params(raw_params, specs):
    prepped = []
    for p, (outer_nc, inner_nc, outermost, innermost) in zip(raw_params, specs):
        cin_d, cout_d = outer_nc, inner_nc
        # down conv: (Cout,Cin,kh,kw) -> rows ordered (kh,kw,ci), cols = co
        wd = p["down_w"].transpose(2, 3, 1, 0).reshape(16 * cin_d, cout_d)
        kdp, ndp = _rup(16 * cin_d, 128), _rup(cout_d, 128)
        entry = dict(
            down_cout=cout_d, up_cout=outer_nc,
            wd_mat=_pad2(wd, kdp, ndp, jnp.bfloat16),
            bd_vec=_pad2(p["down_b"][None, :], 1, ndp, jnp.float32),
        )
        # transposed conv: 4 output-parity 2x2 sub-kernels
        #   K_ab[dh,dw] = flip(W)[a+2dh, b+2dw], rows ordered (dh,dw,ci)
        up_in = inner_nc if innermost else inner_nc * 2
        wf = jnp.flip(p["up_w"], axis=(2, 3))                 # (ci, co, kh, kw)
        kup, nup = _rup(4 * up_in, 128), _rup(outer_nc, 128)
        mats = []
        for a in range(2):
            for b in range(2):
                sub = wf[:, :, a::2, b::2]                    # (ci, co, dh, dw)
                sub = sub.transpose(2, 3, 0, 1).reshape(4 * up_in, outer_nc)
                mats.append(_pad2(sub, kup, nup, jnp.bfloat16))
        entry["wu_par"] = jnp.stack(mats, axis=0)             # (4, kup, nup)
        entry["bu_vec"] = _pad2(p["up_b"][None, :], 1, nup, jnp.float32)
        if innermost:
            # fused down+up form: for a 1x1 input, out[a,b] = x @ W[:, :, 1+a, 1+b]
            wu = p["up_w"][:, :, 1:3, 1:3].transpose(0, 2, 3, 1)  # (ci, a, b, co)
            wu = wu.reshape(up_in, 4 * outer_nc)
            nfu = _rup(4 * outer_nc, 128)
            entry["wu_fused"] = _pad2(wu, ndp, nfu, jnp.bfloat16)
            entry["bu_fused"] = _pad2(jnp.tile(p["up_b"], 4)[None, :], 1, nfu,
                                      jnp.float32)
        prepped.append(entry)
    return prepped


# ---------------------------------------------------------------------------
# Forward pass (opt.use_norm == 0, use_dropout=False, skip=False)
# TODO(synk): BatchNorm / Dropout branches are not present in this config,
# exactly matching the PyTorch graph built for opt.use_norm == 0.
# ---------------------------------------------------------------------------
def _leaky_relu(x):
    return jnp.where(x >= 0, x, 0.2 * x)


def unet_forward(prepped, specs, x_nchw):
    x = jnp.transpose(x_nchw, (0, 2, 3, 1))                   # NHWC end-to-end

    def apply(idx, xin):
        p = prepped[idx]
        outer_nc, inner_nc, outermost, innermost = specs[idx]
        # down path: [LeakyReLU(0.2) (absent for outermost), Conv2d k4 s2 p1]
        xa = xin if outermost else _leaky_relu(xin)           # 1x, pre-im2col
        if innermost and xin.shape[1] == 2 and xin.shape[2] == 2:
            # fused down-conv + ReLU + up-conv for the innermost block
            N = xin.shape[0]
            patches, _, _ = _im2col_down(xa, p["wd_mat"].shape[0])
            u = innermost_fused(patches, p)[:, :4 * outer_nc]
            u = u.reshape(N, 2, 2, outer_nc)
        else:
            d = down_conv(xa, p)
            mid = d if innermost else apply(idx - 1, d)
            mid = jnp.maximum(mid, 0.0)                       # uprelu, pre-im2col
            u = up_conv(mid, p, out_act="tanh" if outermost else None)
        if outermost:
            return u
        # torch.cat([self.model(x), x], 1) -> channels-last concat [u, xin]
        return jnp.concatenate([u, xin], axis=-1)

    out = apply(len(prepped) - 1, x)
    return jnp.transpose(out, (0, 3, 1, 2))                   # back to NCHW


# ---------------------------------------------------------------------------
if __name__ == "__main__":
    input_nc = output_nc = 4
    ngf = 8
    num_downs = 5                     # spatial must be divisible by 2**num_downs
    N, H, W = 2, 32, 32

    key = jax.random.PRNGKey(0)
    kx, kp = jax.random.split(key)
    x = jax.random.normal(kx, (N, input_nc, H, W), jnp.float32)   # NCHW input

    specs = build_unet_specs(input_nc, output_nc, ngf, num_downs)
    raw_params = build_unet_params(kp, specs)
    prepped = prepare_params(raw_params, specs)

    fwd = jax.jit(lambda inp: unet_forward(prepped, specs, inp))
    out = fwd(x)
    jax.block_until_ready(out)

    assert out.shape == (N, output_nc, H, W), out.shape
    assert bool(jnp.all(jnp.isfinite(out)))
    print("KERNEL_OK")
</pallas_src>

<mosaic_0001>
module attributes {stable_mosaic.version = 11 : i64} {
  func.func @_mm_bias_act_kernel(%arg0: i32, %arg1: memref<256x128xbf16, #tpu.memory_space<vmem>>, %arg2: memref<128x128xbf16, #tpu.memory_space<vmem>>, %arg3: memref<1x128xf32, #tpu.memory_space<vmem>>, %arg4: memref<256x128xf32, #tpu.memory_space<vmem>>) attributes {dimension_semantics = [#tpu.dimension_semantics<parallel>], iteration_bounds = array<i64: 2>, scalar_prefetch = 0 : i64, scratch_operands = 0 : i64, tpu.core_type = #tpu.core_type<tc>, window_params = [{transform_indices = @transform_0, window_bounds = array<i64: 256, 128>}, {pipeline_mode = #tpu.pipeline_mode<synchronous>, transform_indices = @transform_1, window_bounds = array<i64: 128, 128>}, {pipeline_mode = #tpu.pipeline_mode<synchronous>, transform_indices = @transform_2, window_bounds = array<i64: 1, 128>}, {transform_indices = @transform_3, window_bounds = array<i64: 256, 128>}]} {
    %c0 = arith.constant 0 : index
    %c0_0 = arith.constant 0 : index
    %0 = vector.load %arg1[%c0, %c0_0] : memref<256x128xbf16, #tpu.memory_space<vmem>>, vector<256x128xbf16>
    %c0_1 = arith.constant 0 : index
    %c0_2 = arith.constant 0 : index
    %1 = vector.load %arg2[%c0_1, %c0_2] : memref<128x128xbf16, #tpu.memory_space<vmem>>, vector<128x128xbf16>
    %cst = arith.constant dense<0.000000e+00> : vector<256x128xf32>
    %2 = tpu.matmul %0, %1, %cst {dimension_numbers = #tpu.dot_dimension_numbers<[1], [0], [0], [1], [0, 0, 1, 1], [], []>} : vector<256x128xbf16>, vector<128x128xbf16>, vector<256x128xf32> -> vector<256x128xf32>
    %c0_3 = arith.constant 0 : index
    %c0_4 = arith.constant 0 : index
    %3 = vector.load %arg3[%c0_3, %c0_4] : memref<1x128xf32, #tpu.memory_space<vmem>>, vector<1x128xf32>
    %4 = vector.broadcast %3 : vector<1x128xf32> to vector<256x128xf32>
    %5 = arith.addf %2, %4 : vector<256x128xf32>
    %c0_5 = arith.constant 0 : index
    %c0_6 = arith.constant 0 : index
    %6 = vector.load %arg4[%c0_5, %c0_6] : memref<256x128xf32, #tpu.memory_space<vmem>>, vector<256x128xf32>
    tpu.vector_store %arg4[%c0_5, %c0_6], %5 {strides = array<i32>} : memref<256x128xf32, #tpu.memory_space<vmem>>, vector<256x128xf32>,
    return
  }
  func.func @transform_0(%arg0: i32) -> (i32, i32) {
    %c0_i32 = arith.constant 0 : i32
    %c0_i32_0 = arith.constant 0 : i32
    return %arg0, %c0_i32 : i32, i32
  }
  func.func @transform_1(%arg0: i32) -> (i32, i32) {
    %c0_i32 = arith.constant 0 : i32
    %c0_i32_0 = arith.constant 0 : i32
    %c0_i32_1 = arith.constant 0 : i32
    return %c0_i32, %c0_i32_0 : i32, i32
  }
  func.func @transform_2(%arg0: i32) -> (i32, i32) {
    %c0_i32 = arith.constant 0 : i32
    %c0_i32_0 = arith.constant 0 : i32
    %c0_i32_1 = arith.constant 0 : i32
    return %c0_i32, %c0_i32_0 : i32, i32
  }
  func.func @transform_3(%arg0: i32) -> (i32, i32) {
    %c0_i32 = arith.constant 0 : i32
    %c0_i32_0 = arith.constant 0 : i32
    return %arg0, %c0_i32 : i32, i32
  }
}

module attributes {stable_mosaic.version = 11 : i64} {
  func.func @_mm_bias_act_kernel(%arg0: i32, %arg1: memref<64x128xbf16, #tpu.memory_space<vmem>>, %arg2: memref<128x128xbf16, #tpu.memory_space<vmem>>, %arg3: memref<1x128xf32, #tpu.memory_space<vmem>>, %arg4: memref<64x128xf32, #tpu.memory_space<vmem>>) attributes {dimension_semantics = [#tpu.dimension_semantics<parallel>], iteration_bounds = array<i64: 2>, scalar_prefetch = 0 : i64, scratch_operands = 0 : i64, tpu.core_type = #tpu.core_type<tc>, window_params = [{transform_indices = @transform_0, window_bounds = array<i64: 64, 128>}, {pipeline_mode = #tpu.pipeline_mode<synchronous>, transform_indices = @transform_1, window_bounds = array<i64: 128, 128>}, {pipeline_mode = #tpu.pipeline_mode<synchronous>, transform_indices = @transform_2, window_bounds = array<i64: 1, 128>}, {transform_indices = @transform_3, window_bounds = array<i64: 64, 128>}]} {
    %c0 = arith.constant 0 : index
    %c0_0 = arith.constant 0 : index
    %0 = vector.load %arg1[%c0, %c0_0] : memref<64x128xbf16, #tpu.memory_space<vmem>>, vector<64x128xbf16>
    %c0_1 = arith.constant 0 : index
    %c0_2 = arith.constant 0 : index
    %1 = vector.load %arg2[%c0_1, %c0_2] : memref<128x128xbf16, #tpu.memory_space<vmem>>, vector<128x128xbf16>
    %cst = arith.constant dense<0.000000e+00> : vector<64x128xf32>
    %2 = tpu.matmul %0, %1, %cst {dimension_numbers = #tpu.dot_dimension_numbers<[1], [0], [0], [1], [0, 0, 1, 1], [], []>} : vector<64x128xbf16>, vector<128x128xbf16>, vector<64x128xf32> -> vector<64x128xf32>
    %c0_3 = arith.constant 0 : index
    %c0_4 = arith.constant 0 : index
    %3 = vector.load %arg3[%c0_3, %c0_4] : memref<1x128xf32, #tpu.memory_space<vmem>>, vector<1x128xf32>
    %4 = vector.broadcast %3 : vector<1x128xf32> to vector<64x128xf32>
    %5 = arith.addf %2, %4 : vector<64x128xf32>
    %c0_5 = arith.constant 0 : index
    %c0_6 = arith.constant 0 : index
    %6 = vector.load %arg4[%c0_5, %c0_6] : memref<64x128xf32, #tpu.memory_space<vmem>>, vector<64x128xf32>
    tpu.vector_store %arg4[%c0_5, %c0_6], %5 {strides = array<i32>} : memref<64x128xf32, #tpu.memory_space<vmem>>, vector<64x128xf32>,
    return
  }
  func.func @transform_0(%arg0: i32) -> (i32, i32) {
    %c0_i32 = arith.constant 0 : i32
    %c0_i32_0 = arith.constant 0 : i32
    return %arg0, %c0_i32 : i32, i32
  }
  func.func @transform_1(%arg0: i32) -> (i32, i32) {
    %c0_i32 = arith.constant 0 : i32
    %c0_i32_0 = arith.constant 0 : i32
    %c0_i32_1 = arith.constant 0 : i32
    return %c0_i32, %c0_i32_0 : i32, i32
  }
  func.func @transform_2(%arg0: i32) -> (i32, i32) {
    %c0_i32 = arith.constant 0 : i32
    %c0_i32_0 = arith.constant 0 : i32
    %c0_i32_1 = arith.constant 0 : i32
    return %c0_i32, %c0_i32_0 : i32, i32
  }
  func.func @transform_3(%arg0: i32) -> (i32, i32) {
    %c0_i32 = arith.constant 0 : i32
    %c0_i32_0 = arith.constant 0 : i32
    return %arg0, %c0_i32 : i32, i32
  }
}

module attributes {stable_mosaic.version = 11 : i64} {
  func.func @_mm_bias_act_kernel(%arg0: i32, %arg1: memref<16x256xbf16, #tpu.memory_space<vmem>>, %arg2: memref<256x128xbf16, #tpu.memory_space<vmem>>, %arg3: memref<1x128xf32, #tpu.memory_space<vmem>>, %arg4: memref<16x128xf32, #tpu.memory_space<vmem>>) attributes {dimension_semantics = [#tpu.dimension_semantics<parallel>], iteration_bounds = array<i64: 2>, scalar_prefetch = 0 : i64, scratch_operands = 0 : i64, tpu.core_type = #tpu.core_type<tc>, window_params = [{transform_indices = @transform_0, window_bounds = array<i64: 16, 256>}, {pipeline_mode = #tpu.pipeline_mode<synchronous>, transform_indices = @transform_1, window_bounds = array<i64: 256, 128>}, {pipeline_mode = #tpu.pipeline_mode<synchronous>, transform_indices = @transform_2, window_bounds = array<i64: 1, 128>}, {transform_indices = @transform_3, window_bounds = array<i64: 16, 128>}]} {
    %c0 = arith.constant 0 : index
    %c0_0 = arith.constant 0 : index
    %0 = vector.load %arg1[%c0, %c0_0] : memref<16x256xbf16, #tpu.memory_space<vmem>>, vector<16x256xbf16>
    %c0_1 = arith.constant 0 : index
    %c0_2 = arith.constant 0 : index
    %1 = vector.load %arg2[%c0_1, %c0_2] : memref<256x128xbf16, #tpu.memory_space<vmem>>, vector<256x128xbf16>
    %cst = arith.constant dense<0.000000e+00> : vector<16x128xf32>
    %2 = tpu.matmul %0, %1, %cst {dimension_numbers = #tpu.dot_dimension_numbers<[1], [0], [0], [1], [0, 0, 1, 1], [], []>} : vector<16x256xbf16>, vector<256x128xbf16>, vector<16x128xf32> -> vector<16x128xf32>
    %c0_3 = arith.constant 0 : index
    %c0_4 = arith.constant 0 : index
    %3 = vector.load %arg3[%c0_3, %c0_4] : memref<1x128xf32, #tpu.memory_space<vmem>>, vector<1x128xf32>
    %4 = vector.broadcast %3 : vector<1x128xf32> to vector<16x128xf32>
    %5 = arith.addf %2, %4 : vector<16x128xf32>
    %c0_5 = arith.constant 0 : index
    %c0_6 = arith.constant 0 : index
    %6 = vector.load %arg4[%c0_5, %c0_6] : memref<16x128xf32, #tpu.memory_space<vmem>>, vector<16x128xf32>
    tpu.vector_store %arg4[%c0_5, %c0_6], %5 {strides = array<i32>} : memref<16x128xf32, #tpu.memory_space<vmem>>, vector<16x128xf32>,
    return
  }
  func.func @transform_0(%arg0: i32) -> (i32, i32) {
    %c0_i32 = arith.constant 0 : i32
    %c0_i32_0 = arith.constant 0 : i32
    return %arg0, %c0_i32 : i32, i32
  }
  func.func @transform_1(%arg0: i32) -> (i32, i32) {
    %c0_i32 = arith.constant 0 : i32
    %c0_i32_0 = arith.constant 0 : i32
    %c0_i32_1 = arith.constant 0 : i32
    return %c0_i32, %c0_i32_0 : i32, i32
  }
  func.func @transform_2(%arg0: i32) -> (i32, i32) {
    %c0_i32 = arith.constant 0 : i32
    %c0_i32_0 = arith.constant 0 : i32
    %c0_i32_1 = arith.constant 0 : i32
    return %c0_i32, %c0_i32_0 : i32, i32
  }
  func.func @transform_3(%arg0: i32) -> (i32, i32) {
    %c0_i32 = arith.constant 0 : i32
    %c0_i32_0 = arith.constant 0 : i32
    return %arg0, %c0_i32 : i32, i32
  }
}

module attributes {stable_mosaic.version = 11 : i64} {
  func.func @_innermost_fused_kernel(%arg0: i32, %arg1: memref<2x1024xbf16, #tpu.memory_space<vmem>>, %arg2: memref<1024x128xbf16, #tpu.memory_space<vmem>>, %arg3: memref<1x128xf32, #tpu.memory_space<vmem>>, %arg4: memref<128x256xbf16, #tpu.memory_space<vmem>>, %arg5: memref<1x256xf32, #tpu.memory_space<vmem>>, %arg6: memref<2x256xf32, #tpu.memory_space<vmem>>) attributes {dimension_semantics = [#tpu.dimension_semantics<arbitrary>], iteration_bounds = array<i64: 1>, scalar_prefetch = 0 : i64, scratch_operands = 0 : i64, tpu.core_type = #tpu.core_type<tc>, window_params = [{pipeline_mode = #tpu.pipeline_mode<synchronous>, transform_indices = @transform_0, window_bounds = array<i64: 2, 1024>}, {pipeline_mode = #tpu.pipeline_mode<synchronous>, transform_indices = @transform_1, window_bounds = array<i64: 1024, 128>}, {pipeline_mode = #tpu.pipeline_mode<synchronous>, transform_indices = @transform_2, window_bounds = array<i64: 1, 128>}, {pipeline_mode = #tpu.pipeline_mode<synchronous>, transform_indices = @transform_3, window_bounds = array<i64: 128, 256>}, {pipeline_mode = #tpu.pipeline_mode<synchronous>, transform_indices = @transform_4, window_bounds = array<i64: 1, 256>}, {pipeline_mode = #tpu.pipeline_mode<synchronous>, transform_indices = @transform_5, window_bounds = array<i64: 2, 256>}]} {
    %c0 = arith.constant 0 : index
    %c0_0 = arith.constant 0 : index
    %0 = vector.load %arg1[%c0, %c0_0] : memref<2x1024xbf16, #tpu.memory_space<vmem>>, vector<2x1024xbf16>
    %c0_1 = arith.constant 0 : index
    %c0_2 = arith.constant 0 : index
    %1 = vector.load %arg2[%c0_1, %c0_2] : memref<1024x128xbf16, #tpu.memory_space<vmem>>, vector<1024x128xbf16>
    %cst = arith.constant dense<0.000000e+00> : vector<2x128xf32>
    %2 = tpu.matmul %0, %1, %cst {dimension_numbers = #tpu.dot_dimension_numbers<[1], [0], [0], [1], [0, 0, 1, 1], [], []>} : vector<2x1024xbf16>, vector<1024x128xbf16>, vector<2x128xf32> -> vector<2x128xf32>
    %c0_3 = arith.constant 0 : index
    %c0_4 = arith.constant 0 : index
    %3 = vector.load %arg3[%c0_3, %c0_4] : memref<1x128xf32, #tpu.memory_space<vmem>>, vector<1x128xf32>
    %4 = vector.broadcast %3 : vector<1x128xf32> to vector<2x128xf32>
    %5 = arith.addf %2, %4 : vector<2x128xf32>
    %cst_5 = arith.constant 0.000000e+00 : f32
    %6 = vector.broadcast %cst_5 : f32 to vector<2x128xf32>
    %7 = arith.maximumf %5, %6 : vector<2x128xf32>
    %8 = arith.truncf %7 : vector<2x128xf32> to vector<2x128xbf16>
    %c0_6 = arith.constant 0 : index
    %c0_7 = arith.constant 0 : index
    %9 = vector.load %arg4[%c0_6, %c0_7] : memref<128x256xbf16, #tpu.memory_space<vmem>>, vector<128x256xbf16>
    %cst_8 = arith.constant dense<0.000000e+00> : vector<2x256xf32>
    %10 = tpu.matmul %8, %9, %cst_8 {dimension_numbers = #tpu.dot_dimension_numbers<[1], [0], [0], [1], [0, 0, 1, 1], [], []>} : vector<2x128xbf16>, vector<128x256xbf16>, vector<2x256xf32> -> vector<2x256xf32>
    %c0_9 = arith.constant 0 : index
    %c0_10 = arith.constant 0 : index
    %11 = vector.load %arg5[%c0_9, %c0_10] : memref<1x256xf32, #tpu.memory_space<vmem>>, vector<1x256xf32>
    %12 = vector.broadcast %11 : vector<1x256xf32> to vector<2x256xf32>
    %13 = arith.addf %10, %12 : vector<2x256xf32>
    %c0_11 = arith.constant 0 : index
    %c0_12 = arith.constant 0 : index
    %14 = vector.load %arg6[%c0_11, %c0_12] : memref<2x256xf32, #tpu.memory_space<vmem>>, vector<2x256xf32>
    tpu.vector_store %arg6[%c0_11, %c0_12], %13 {strides = array<i32>} : memref<2x256xf32, #tpu.memory_space<vmem>>, vector<2x256xf32>,
    return
  }
  func.func @transform_0(%arg0: i32) -> (i32, i32) {
    %c0_i32 = arith.constant 0 : i32
    %c0_i32_0 = arith.constant 0 : i32
    %c0_i32_1 = arith.constant 0 : i32
    return %c0_i32, %c0_i32_0 : i32, i32
  }
  func.func @transform_1(%arg0: i32) -> (i32, i32) {
    %c0_i32 = arith.constant 0 : i32
    %c0_i32_0 = arith.constant 0 : i32
    %c0_i32_1 = arith.constant 0 : i32
    return %c0_i32, %c0_i32_0 : i32, i32
  }
  func.func @transform_2(%arg0: i32) -> (i32, i32) {
    %c0_i32 = arith.constant 0 : i32
    %c0_i32_0 = arith.constant 0 : i32
    %c0_i32_1 = arith.constant 0 : i32
    return %c0_i32, %c0_i32_0 : i32, i32
  }
  func.func @transform_3(%arg0: i32) -> (i32, i32) {
    %c0_i32 = arith.constant 0 : i32
    %c0_i32_0 = arith.constant 0 : i32
    %c0_i32_1 = arith.constant 0 : i32
    return %c0_i32, %c0_i32_0 : i32, i32
  }
  func.func @transform_4(%arg0: i32) -> (i32, i32) {
    %c0_i32 = arith.constant 0 : i32
    %c0_i32_0 = arith.constant 0 : i32
    %c0_i32_1 = arith.constant 0 : i32
    return %c0_i32, %c0_i32_0 : i32, i32
  }
  func.func @transform_5(%arg0: i32) -> (i32, i32) {
    %c0_i32 = arith.constant 0 : i32
    %c0_i32_0 = arith.constant 0 : i32
    %c0_i32_1 = arith.constant 0 : i32
    return %c0_i32, %c0_i32_0 : i32, i32
  }
}

module attributes {stable_mosaic.version = 11 : i64} {
  func.func @_mm_bias_act_kernel(%arg0: i32, %arg1: memref<8x512xbf16, #tpu.memory_space<vmem>>, %arg2: memref<512x128xbf16, #tpu.memory_space<vmem>>, %arg3: memref<1x128xf32, #tpu.memory_space<vmem>>, %arg4: memref<8x128xf32, #tpu.memory_space<vmem>>) attributes {dimension_semantics = [#tpu.dimension_semantics<parallel>], iteration_bounds = array<i64: 1>, scalar_prefetch = 0 : i64, scratch_operands = 0 : i64, tpu.core_type = #tpu.core_type<tc>, window_params = [{transform_indices = @transform_0, window_bounds = array<i64: 8, 512>}, {pipeline_mode = #tpu.pipeline_mode<synchronous>, transform_indices = @transform_1, window_bounds = array<i64: 512, 128>}, {pipeline_mode = #tpu.pipeline_mode<synchronous>, transform_indices = @transform_2, window_bounds = array<i64: 1, 128>}, {transform_indices = @transform_3, window_bounds = array<i64: 8, 128>}]} {
    %c0 = arith.constant 0 : index
    %c0_0 = arith.constant 0 : index
    %0 = vector.load %arg1[%c0, %c0_0] : memref<8x512xbf16, #tpu.memory_space<vmem>>, vector<8x512xbf16>
    %c0_1 = arith.constant 0 : index
    %c0_2 = arith.constant 0 : index
    %1 = vector.load %arg2[%c0_1, %c0_2] : memref<512x128xbf16, #tpu.memory_space<vmem>>, vector<512x128xbf16>
    %cst = arith.constant dense<0.000000e+00> : vector<8x128xf32>
    %2 = tpu.matmul %0, %1, %cst {dimension_numbers = #tpu.dot_dimension_numbers<[1], [0], [0], [1], [0, 0, 1, 1], [], []>} : vector<8x512xbf16>, vector<512x128xbf16>, vector<8x128xf32> -> vector<8x128xf32>
    %c0_3 = arith.constant 0 : index
    %c0_4 = arith.constant 0 : index
    %3 = vector.load %arg3[%c0_3, %c0_4] : memref<1x128xf32, #tpu.memory_space<vmem>>, vector<1x128xf32>
    %4 = vector.broadcast %3 : vector<1x128xf32> to vector<8x128xf32>
    %5 = arith.addf %2, %4 : vector<8x128xf32>
    %c0_5 = arith.constant 0 : index
    %c0_6 = arith.constant 0 : index
    %6 = vector.load %arg4[%c0_5, %c0_6] : memref<8x128xf32, #tpu.memory_space<vmem>>, vector<8x128xf32>
    tpu.vector_store %arg4[%c0_5, %c0_6], %5 {strides = array<i32>} : memref<8x128xf32, #tpu.memory_space<vmem>>, vector<8x128xf32>,
    return
  }
  func.func @transform_0(%arg0: i32) -> (i32, i32) {
    %c0_i32 = arith.constant 0 : i32
    %c0_i32_0 = arith.constant 0 : i32
    return %arg0, %c0_i32 : i32, i32
  }
  func.func @transform_1(%arg0: i32) -> (i32, i32) {
    %c0_i32 = arith.constant 0 : i32
    %c0_i32_0 = arith.constant 0 : i32
    %c0_i32_1 = arith.constant 0 : i32
    return %c0_i32, %c0_i32_0 : i32, i32
  }
  func.func @transform_2(%arg0: i32) -> (i32, i32) {
    %c0_i32 = arith.constant 0 : i32
    %c0_i32_0 = arith.constant 0 : i32
    %c0_i32_1 = arith.constant 0 : i32
    return %c0_i32, %c0_i32_0 : i32, i32
  }
  func.func @transform_3(%arg0: i32) -> (i32, i32) {
    %c0_i32 = arith.constant 0 : i32
    %c0_i32_0 = arith.constant 0 : i32
    return %arg0, %c0_i32 : i32, i32
  }
}

module attributes {stable_mosaic.version = 11 : i64} {
  func.func @_mm_bias_act_kernel(%arg0: i32, %arg1: i32, %arg2: memref<1x8x512xbf16, #tpu.memory_space<vmem>>, %arg3: memref<1x512x128xbf16, #tpu.memory_space<vmem>>, %arg4: memref<1x128xf32, #tpu.memory_space<vmem>>, %arg5: memref<1x8x128xf32, #tpu.memory_space<vmem>>) attributes {dimension_semantics = [#tpu.dimension_semantics<parallel>, #tpu.dimension_semantics<parallel>], iteration_bounds = array<i64: 4, 1>, scalar_prefetch = 0 : i64, scratch_operands = 0 : i64, tpu.core_type = #tpu.core_type<tc>, window_params = [{transform_indices = @transform_0, window_bounds = array<i64: 1, 8, 512>}, {transform_indices = @transform_1, window_bounds = array<i64: 1, 512, 128>}, {pipeline_mode = #tpu.pipeline_mode<synchronous>, transform_indices = @transform_2, window_bounds = array<i64: 1, 128>}, {transform_indices = @transform_3, window_bounds = array<i64: 1, 8, 128>}]} {
    %c0 = arith.constant 0 : index
    %c0_0 = arith.constant 0 : index
    %c0_1 = arith.constant 0 : index
    %0 = vector.load %arg2[%c0, %c0_0, %c0_1] : memref<1x8x512xbf16, #tpu.memory_space<vmem>>, vector<1x8x512xbf16>
    %1 = vector.shape_cast %0 : vector<1x8x512xbf16> to vector<8x512xbf16>
    %c0_2 = arith.constant 0 : index
    %c0_3 = arith.constant 0 : index
    %c0_4 = arith.constant 0 : index
    %2 = vector.load %arg3[%c0_2, %c0_3, %c0_4] : memref<1x512x128xbf16, #tpu.memory_space<vmem>>, vector<1x512x128xbf16>
    %3 = vector.shape_cast %2 : vector<1x512x128xbf16> to vector<512x128xbf16>
    %cst = arith.constant dense<0.000000e+00> : vector<8x128xf32>
    %4 = tpu.matmul %1, %3, %cst {dimension_numbers = #tpu.dot_dimension_numbers<[1], [0], [0], [1], [0, 0, 1, 1], [], []>} : vector<8x512xbf16>, vector<512x128xbf16>, vector<8x128xf32> -> vector<8x128xf32>
    %c0_5 = arith.constant 0 : index
    %c0_6 = arith.constant 0 : index
    %5 = vector.load %arg4[%c0_5, %c0_6] : memref<1x128xf32, #tpu.memory_space<vmem>>, vector<1x128xf32>
    %6 = vector.broadcast %5 : vector<1x128xf32> to vector<8x128xf32>
    %7 = arith.addf %4, %6 : vector<8x128xf32>
    %c0_7 = arith.constant 0 : index
    %c0_8 = arith.constant 0 : index
    %c0_9 = arith.constant 0 : index
    %8 = vector.load %arg5[%c0_7, %c0_8, %c0_9] : memref<1x8x128xf32, #tpu.memory_space<vmem>>, vector<1x8x128xf32>
    %9 = vector.shape_cast %8 : vector<1x8x128xf32> to vector<8x128xf32>
    %10 = vector.shape_cast %7 : vector<8x128xf32> to vector<1x8x128xf32>
    tpu.vector_store %arg5[%c0_7, %c0_8, %c0_9], %10 {strides = array<i32>} : memref<1x8x128xf32, #tpu.memory_space<vmem>>, vector<1x8x128xf32>,
    return
  }
  func.func @transform_0(%arg0: i32, %arg1: i32) -> (i32, i32, i32) {
    %c0_i32 = arith.constant 0 : i32
    %c0_i32_0 = arith.constant 0 : i32
    return %arg0, %arg1, %c0_i32 : i32, i32, i32
  }
  func.func @transform_1(%arg0: i32, %arg1: i32) -> (i32, i32, i32) {
    %c0_i32 = arith.constant 0 : i32
    %c0_i32_0 = arith.constant 0 : i32
    %c0_i32_1 = arith.constant 0 : i32
    return %arg0, %c0_i32, %c0_i32_0 : i32, i32, i32
  }
  func.func @transform_2(%arg0: i32, %arg1: i32) -> (i32, i32) {
    %c0_i32 = arith.constant 0 : i32
    %c0_i32_0 = arith.constant 0 : i32
    %c0_i32_1 = arith.constant 0 : i32
    return %c0_i32, %c0_i32_0 : i32, i32
  }
  func.func @transform_3(%arg0: i32, %arg1: i32) -> (i32, i32, i32) {
    %c0_i32 = arith.constant 0 : i32
    %c0_i32_0 = arith.constant 0 : i32
    return %arg0, %arg1, %c0_i32 : i32, i32, i32
  }
}

module attributes {stable_mosaic.version = 11 : i64} {
  func.func @_mm_bias_act_kernel(%arg0: i32, %arg1: i32, %arg2: memref<1x16x256xbf16, #tpu.memory_space<vmem>>, %arg3: memref<1x256x128xbf16, #tpu.memory_space<vmem>>, %arg4: memref<1x128xf32, #tpu.memory_space<vmem>>, %arg5: memref<1x16x128xf32, #tpu.memory_space<vmem>>) attributes {dimension_semantics = [#tpu.dimension_semantics<parallel>, #tpu.dimension_semantics<parallel>], iteration_bounds = array<i64: 4, 2>, scalar_prefetch = 0 : i64, scratch_operands = 0 : i64, tpu.core_type = #tpu.core_type<tc>, window_params = [{transform_indices = @transform_0, window_bounds = array<i64: 1, 16, 256>}, {transform_indices = @transform_1, window_bounds = array<i64: 1, 256, 128>}, {pipeline_mode = #tpu.pipeline_mode<synchronous>, transform_indices = @transform_2, window_bounds = array<i64: 1, 128>}, {transform_indices = @transform_3, window_bounds = array<i64: 1, 16, 128>}]} {
    %c0 = arith.constant 0 : index
    %c0_0 = arith.constant 0 : index
    %c0_1 = arith.constant 0 : index
    %0 = vector.load %arg2[%c0, %c0_0, %c0_1] : memref<1x16x256xbf16, #tpu.memory_space<vmem>>, vector<1x16x256xbf16>
    %1 = vector.shape_cast %0 : vector<1x16x256xbf16> to vector<16x256xbf16>
    %c0_2 = arith.constant 0 : index
    %c0_3 = arith.constant 0 : index
    %c0_4 = arith.constant 0 : index
    %2 = vector.load %arg3[%c0_2, %c0_3, %c0_4] : memref<1x256x128xbf16, #tpu.memory_space<vmem>>, vector<1x256x128xbf16>
    %3 = vector.shape_cast %2 : vector<1x256x128xbf16> to vector<256x128xbf16>
    %cst = arith.constant dense<0.000000e+00> : vector<16x128xf32>
    %4 = tpu.matmul %1, %3, %cst {dimension_numbers = #tpu.dot_dimension_numbers<[1], [0], [0], [1], [0, 0, 1, 1], [], []>} : vector<16x256xbf16>, vector<256x128xbf16>, vector<16x128xf32> -> vector<16x128xf32>
    %c0_5 = arith.constant 0 : index
    %c0_6 = arith.constant 0 : index
    %5 = vector.load %arg4[%c0_5, %c0_6] : memref<1x128xf32, #tpu.memory_space<vmem>>, vector<1x128xf32>
    %6 = vector.broadcast %5 : vector<1x128xf32> to vector<16x128xf32>
    %7 = arith.addf %4, %6 : vector<16x128xf32>
    %c0_7 = arith.constant 0 : index
    %c0_8 = arith.constant 0 : index
    %c0_9 = arith.constant 0 : index
    %8 = vector.load %arg5[%c0_7, %c0_8, %c0_9] : memref<1x16x128xf32, #tpu.memory_space<vmem>>, vector<1x16x128xf32>
    %9 = vector.shape_cast %8 : vector<1x16x128xf32> to vector<16x128xf32>
    %10 = vector.shape_cast %7 : vector<16x128xf32> to vector<1x16x128xf32>
    tpu.vector_store %arg5[%c0_7, %c0_8, %c0_9], %10 {strides = array<i32>} : memref<1x16x128xf32, #tpu.memory_space<vmem>>, vector<1x16x128xf32>,
    return
  }
  func.func @transform_0(%arg0: i32, %arg1: i32) -> (i32, i32, i32) {
    %c0_i32 = arith.constant 0 : i32
    %c0_i32_0 = arith.constant 0 : i32
    return %arg0, %arg1, %c0_i32 : i32, i32, i32
  }
  func.func @transform_1(%arg0: i32, %arg1: i32) -> (i32, i32, i32) {
    %c0_i32 = arith.constant 0 : i32
    %c0_i32_0 = arith.constant 0 : i32
    %c0_i32_1 = arith.constant 0 : i32
    return %arg0, %c0_i32, %c0_i32_0 : i32, i32, i32
  }
  func.func @transform_2(%arg0: i32, %arg1: i32) -> (i32, i32) {
    %c0_i32 = arith.constant 0 : i32
    %c0_i32_0 = arith.constant 0 : i32
    %c0_i32_1 = arith.constant 0 : i32
    return %c0_i32, %c0_i32_0 : i32, i32
  }
  func.func @transform_3(%arg0: i32, %arg1: i32) -> (i32, i32, i32) {
    %c0_i32 = arith.constant 0 : i32
    %c0_i32_0 = arith.constant 0 : i32
    return %arg0, %arg1, %c0_i32 : i32, i32, i32
  }
}

module attributes {stable_mosaic.version = 11 : i64} {
  func.func @_mm_bias_act_kernel(%arg0: i32, %arg1: i32, %arg2: memref<1x64x128xbf16, #tpu.memory_space<vmem>>, %arg3: memref<1x128x128xbf16, #tpu.memory_space<vmem>>, %arg4: memref<1x128xf32, #tpu.memory_space<vmem>>, %arg5: memref<1x64x128xf32, #tpu.memory_space<vmem>>) attributes {dimension_semantics = [#tpu.dimension_semantics<parallel>, #tpu.dimension_semantics<parallel>], iteration_bounds = array<i64: 4, 2>, scalar_prefetch = 0 : i64, scratch_operands = 0 : i64, tpu.core_type = #tpu.core_type<tc>, window_params = [{transform_indices = @transform_0, window_bounds = array<i64: 1, 64, 128>}, {transform_indices = @transform_1, window_bounds = array<i64: 1, 128, 128>}, {pipeline_mode = #tpu.pipeline_mode<synchronous>, transform_indices = @transform_2, window_bounds = array<i64: 1, 128>}, {transform_indices = @transform_3, window_bounds = array<i64: 1, 64, 128>}]} {
    %c0 = arith.constant 0 : index
    %c0_0 = arith.constant 0 : index
    %c0_1 = arith.constant 0 : index
    %0 = vector.load %arg2[%c0, %c0_0, %c0_1] : memref<1x64x128xbf16, #tpu.memory_space<vmem>>, vector<1x64x128xbf16>
    %1 = vector.shape_cast %0 : vector<1x64x128xbf16> to vector<64x128xbf16>
    %c0_2 = arith.constant 0 : index
    %c0_3 = arith.constant 0 : index
    %c0_4 = arith.constant 0 : index
    %2 = vector.load %arg3[%c0_2, %c0_3, %c0_4] : memref<1x128x128xbf16, #tpu.memory_space<vmem>>, vector<1x128x128xbf16>
    %3 = vector.shape_cast %2 : vector<1x128x128xbf16> to vector<128x128xbf16>
    %cst = arith.constant dense<0.000000e+00> : vector<64x128xf32>
    %4 = tpu.matmul %1, %3, %cst {dimension_numbers = #tpu.dot_dimension_numbers<[1], [0], [0], [1], [0, 0, 1, 1], [], []>} : vector<64x128xbf16>, vector<128x128xbf16>, vector<64x128xf32> -> vector<64x128xf32>
    %c0_5 = arith.constant 0 : index
    %c0_6 = arith.constant 0 : index
    %5 = vector.load %arg4[%c0_5, %c0_6] : memref<1x128xf32, #tpu.memory_space<vmem>>, vector<1x128xf32>
    %6 = vector.broadcast %5 : vector<1x128xf32> to vector<64x128xf32>
    %7 = arith.addf %4, %6 : vector<64x128xf32>
    %c0_7 = arith.constant 0 : index
    %c0_8 = arith.constant 0 : index
    %c0_9 = arith.constant 0 : index
    %8 = vector.load %arg5[%c0_7, %c0_8, %c0_9] : memref<1x64x128xf32, #tpu.memory_space<vmem>>, vector<1x64x128xf32>
    %9 = vector.shape_cast %8 : vector<1x64x128xf32> to vector<64x128xf32>
    %10 = vector.shape_cast %7 : vector<64x128xf32> to vector<1x64x128xf32>
    tpu.vector_store %arg5[%c0_7, %c0_8, %c0_9], %10 {strides = array<i32>} : memref<1x64x128xf32, #tpu.memory_space<vmem>>, vector<1x64x128xf32>,
    return
  }
  func.func @transform_0(%arg0: i32, %arg1: i32) -> (i32, i32, i32) {
    %c0_i32 = arith.constant 0 : i32
    %c0_i32_0 = arith.constant 0 : i32
    return %arg0, %arg1, %c0_i32 : i32, i32, i32
  }
  func.func @transform_1(%arg0: i32, %arg1: i32) -> (i32, i32, i32) {
    %c0_i32 = arith.constant 0 : i32
    %c0_i32_0 = arith.constant 0 : i32
    %c0_i32_1 = arith.constant 0 : i32
    return %arg0, %c0_i32, %c0_i32_0 : i32, i32, i32
  }
  func.func @transform_2(%arg0: i32, %arg1: i32) -> (i32, i32) {
    %c0_i32 = arith.constant 0 : i32
    %c0_i32_0 = arith.constant 0 : i32
    %c0_i32_1 = arith.constant 0 : i32
    return %c0_i32, %c0_i32_0 : i32, i32
  }
  func.func @transform_3(%arg0: i32, %arg1: i32) -> (i32, i32, i32) {
    %c0_i32 = arith.constant 0 : i32
    %c0_i32_0 = arith.constant 0 : i32
    return %arg0, %arg1, %c0_i32 : i32, i32, i32
  }
}

module attributes {stable_mosaic.version = 11 : i64} {
  func.func @_mm_bias_act_kernel(%arg0: i32, %arg1: i32, %arg2: memref<1x256x128xbf16, #tpu.memory_space<vmem>>, %arg3: memref<1x128x128xbf16, #tpu.memory_space<vmem>>, %arg4: memref<1x128xf32, #tpu.memory_space<vmem>>, %arg5: memref<1x256x128xf32, #tpu.memory_space<vmem>>) attributes {dimension_semantics = [#tpu.dimension_semantics<parallel>, #tpu.dimension_semantics<parallel>], iteration_bounds = array<i64: 4, 2>, scalar_prefetch = 0 : i64, scratch_operands = 0 : i64, tpu.core_type = #tpu.core_type<tc>, window_params = [{transform_indices = @transform_0, window_bounds = array<i64: 1, 256, 128>}, {transform_indices = @transform_1, window_bounds = array<i64: 1, 128, 128>}, {pipeline_mode = #tpu.pipeline_mode<synchronous>, transform_indices = @transform_2, window_bounds = array<i64: 1, 128>}, {transform_indices = @transform_3, window_bounds = array<i64: 1, 256, 128>}]} {
    %c0 = arith.constant 0 : index
    %c0_0 = arith.constant 0 : index
    %c0_1 = arith.constant 0 : index
    %0 = vector.load %arg2[%c0, %c0_0, %c0_1] : memref<1x256x128xbf16, #tpu.memory_space<vmem>>, vector<1x256x128xbf16>
    %1 = vector.shape_cast %0 : vector<1x256x128xbf16> to vector<256x128xbf16>
    %c0_2 = arith.constant 0 : index
    %c0_3 = arith.constant 0 : index
    %c0_4 = arith.constant 0 : index
    %2 = vector.load %arg3[%c0_2, %c0_3, %c0_4] : memref<1x128x128xbf16, #tpu.memory_space<vmem>>, vector<1x128x128xbf16>
    %3 = vector.shape_cast %2 : vector<1x128x128xbf16> to vector<128x128xbf16>
    %cst = arith.constant dense<0.000000e+00> : vector<256x128xf32>
    %4 = tpu.matmul %1, %3, %cst {dimension_numbers = #tpu.dot_dimension_numbers<[1], [0], [0], [1], [0, 0, 1, 1], [], []>} : vector<256x128xbf16>, vector<128x128xbf16>, vector<256x128xf32> -> vector<256x128xf32>
    %c0_5 = arith.constant 0 : index
    %c0_6 = arith.constant 0 : index
    %5 = vector.load %arg4[%c0_5, %c0_6] : memref<1x128xf32, #tpu.memory_space<vmem>>, vector<1x128xf32>
    %6 = vector.broadcast %5 : vector<1x128xf32> to vector<256x128xf32>
    %7 = arith.addf %4, %6 : vector<256x128xf32>
    %8 = math.tanh %7 : vector<256x128xf32>
    %c0_7 = arith.constant 0 : index
    %c0_8 = arith.constant 0 : index
    %c0_9 = arith.constant 0 : index
    %9 = vector.load %arg5[%c0_7, %c0_8, %c0_9] : memref<1x256x128xf32, #tpu.memory_space<vmem>>, vector<1x256x128xf32>
    %10 = vector.shape_cast %9 : vector<1x256x128xf32> to vector<256x128xf32>
    %11 = vector.shape_cast %8 : vector<256x128xf32> to vector<1x256x128xf32>
    tpu.vector_store %arg5[%c0_7, %c0_8, %c0_9], %11 {strides = array<i32>} : memref<1x256x128xf32, #tpu.memory_space<vmem>>, vector<1x256x128xf32>,
    return
  }
  func.func @transform_0(%arg0: i32, %arg1: i32) -> (i32, i32, i32) {
    %c0_i32 = arith.constant 0 : i32
    %c0_i32_0 = arith.constant 0 : i32
    return %arg0, %arg1, %c0_i32 : i32, i32, i32
  }
  func.func @transform_1(%arg0: i32, %arg1: i32) -> (i32, i32, i32) {
    %c0_i32 = arith.constant 0 : i32
    %c0_i32_0 = arith.constant 0 : i32
    %c0_i32_1 = arith.constant 0 : i32
    return %arg0, %c0_i32, %c0_i32_0 : i32, i32, i32
  }
  func.func @transform_2(%arg0: i32, %arg1: i32) -> (i32, i32) {
    %c0_i32 = arith.constant 0 : i32
    %c0_i32_0 = arith.constant 0 : i32
    %c0_i32_1 = arith.constant 0 : i32
    return %c0_i32, %c0_i32_0 : i32, i32
  }
  func.func @transform_3(%arg0: i32, %arg1: i32) -> (i32, i32, i32) {
    %c0_i32 = arith.constant 0 : i32
    %c0_i32_0 = arith.constant 0 : i32
    return %arg0, %arg1, %c0_i32 : i32, i32, i32
  }
}

</mosaic_0001>

<bundles_post_ra>
// kernel: _lambda_.10
= control target key start
LH: loop header
LB: loop body
LE: loop exit
PB: predicated region body
PF: predicated region fallthrough
CT: control target
= control target key end

     0   :  { %s531_s12 = smov 0   ;;  %s585_s0 = inlined_call_operand.vmem [shape: bf16[128,128], index: 0, kind: input, shape index: {}]   ;;  %s586_s1 = inlined_call_operand.vmem [shape: bf16[128,128], index: 1, kind: input, shape index: {}]   ;;  %s587_s2 = inlined_call_operand.vmem [shape: f32[1,128], index: 2, kind: input, shape index: {}]   ;;  %s588_s3 = inlined_call_operand.vmem [shape: f32[128,128], index: 3, kind: output, shape index: {}]  }
   0x1 LB: > { %s407_s13 = sadd.s32 4294967295, %s509_s12   ;;  %p411_p0 = scmp.ge.s32.totalorder %s509_s12, 1  ;;  %s509_s12 = sphi %s531_s12, %s13_s12  }
   0x2   : > { %p138_p1 = scmp.lt.s32.totalorder %s509_s12, 3 }
   0x4   : > { %p139_p2 = pnand %p411_p0, %p138_p1 }
   0x5   : > { %v491_v0 = vld [vmem:[%s586_s1] sm:$0xff] (!%p139_p2)   ;;  %s412_s16 = sshll.u32 (!%p139_p2), %s407_s13, 3  ;;  %v492_v1 = vld [vmem:[%s586_s1 + $0x8] sm:$0xff] (!%p139_p2)   ;;  %v493_v2 = vld [vmem:[%s586_s1 + $0x10] sm:$0xff] (!%p139_p2)  }
   0x6   : > { %142 = sbr.rel (%p139_p2) target bundleno = 256 (0x100), region = 32  ;;  %p163_p3 = scmp.lt.s32.totalorder (!%p139_p2), %s412_s16, 15  ;;  %443 = vmatprep.subr.bf16.mxu0 (!%p139_p2), %v491_v0  ;;  %467 = vmatprep.subr.bf16.mxu1 (!%p139_p2), %v491_v0  ;;  %v494_v3 = vld [vmem:[%s586_s1 + $0x18] sm:$0xff] (!%p139_p2)   ;;  %v495_v6 = vld [vmem:[%s586_s1 + $0x20] sm:$0xff] (!%p139_p2)   ;;  %v496_v7 = vld [vmem:[%s586_s1 + $0x28] sm:$0xff] (!%p139_p2)  }
   0x7   : > { %444 = vmatpush3.bf16.msra.mxu0 (!%p139_p2), %v491_v0  ;;  %475 = vmatpush3.bf16.msra.mxu1 (!%p139_p2), %v491_v0  ;;  %v497_v8 = vld [vmem:[%s586_s1 + $0x30] sm:$0xff] (!%p139_p2)   ;;  %v498_v9 = vld [vmem:[%s586_s1 + $0x38] sm:$0xff] (!%p139_p2)   ;;  %v416_v12 = vld [vmem:[%s587_s2] ss:$0 sm:$0xff] (!%p139_p2) }
   0x8   : > { %445 = vmatprep.subr.bf16.mxu0 (!%p139_p2), %v492_v1  ;;  %468 = vmatprep.subr.bf16.mxu1 (!%p139_p2), %v492_v1 }
   0xb   : > { %446 = vmatpush3.bf16.msra.mxu0 (!%p139_p2), %v492_v1  ;;  %476 = vmatpush3.bf16.msra.mxu1 (!%p139_p2), %v492_v1 }
   0xc   : > { %447 = vmatprep.subr.bf16.mxu0 (!%p139_p2), %v493_v2  ;;  %469 = vmatprep.subr.bf16.mxu1 (!%p139_p2), %v493_v2 }
   0xd   : > { %s590_s16 = smov (!%p163_p3, %s412_s16), 15 }
   0xe   : > { %s413_s21 = sshll.u32 %s590_s16, 2  ;;  %s415_s8 = sshll.u32 %s590_s16, 3 }
   0xf   : > { %s554_s24 = scalar_lea.vmem %s585_s0, %s413_s21  ;;  %448 = vmatpush3.bf16.msra.mxu0 %v493_v2  ;;  %477 = vmatpush3.bf16.msra.mxu1 %v493_v2  ;;  %s172_s14 = scalar_lea.vmem %s588_s3, %s415_s8 }
  0x10   : > { %v499_v4 = vld [vmem:[%s554_s24] sm:$0xff]   ;;  %v500_v5 = vld [vmem:[%s554_s24 + $0x10] sm:$0xff]   ;;  %449 = vmatprep.subr.bf16.mxu0 %v494_v3  ;;  %470 = vmatprep.subr.bf16.mxu1 %v494_v3  ;;  %v501_v10 = vld [vmem:[%s554_s24 + $0x8] sm:$0xff]  }
  0x11   : > { %459 = vmatprep.mubr.bf16.mxu0 %v499_v4  ;;  %463 = vmatprep.mubr.bf16.mxu1 %v500_v5  ;;  %v502_v11 = vld [vmem:[%s554_s24 + $0x18] sm:$0xff]  }
  0x13   : > { %450 = vmatpush3.bf16.msra.mxu0 %v494_v3  ;;  %478 = vmatpush3.bf16.msra.mxu1 %v494_v3 }
  0x14   : > { %451 = vmatprep.subr.bf16.mxu0 %v495_v6  ;;  %471 = vmatprep.subr.bf16.mxu1 %v495_v6 }
  0x17   : > { %452 = vmatpush3.bf16.msra.mxu0 %v495_v6  ;;  %479 = vmatpush3.bf16.msra.mxu1 %v495_v6 }
  0x18   : > { %453 = vmatprep.subr.bf16.mxu0 %v496_v7  ;;  %472 = vmatprep.subr.bf16.mxu1 %v496_v7 }
  0x1b   : > { %454 = vmatpush3.bf16.msra.mxu0 %v496_v7  ;;  %480 = vmatpush3.bf16.msra.mxu1 %v496_v7 }
  0x1c   : > { %455 = vmatprep.subr.bf16.mxu0 %v497_v8  ;;  %473 = vmatprep.subr.bf16.mxu1 %v497_v8 }
  0x1f   : > { %456 = vmatpush3.bf16.msra.mxu0 %v497_v8  ;;  %481 = vmatpush3.bf16.msra.mxu1 %v497_v8 }
  0x20   : > { %457 = vmatprep.subr.bf16.mxu0 %v498_v9  ;;  %474 = vmatprep.subr.bf16.mxu1 %v498_v9 }
  0x23   : > { %458 = vmatpush3.bf16.msra.mxu0 %v498_v9  ;;  %482 = vmatpush3.bf16.msra.mxu1 %v498_v9 }
  0x26   : > { %460 = vmatmul.mubr.bf16.vlgmr.msra.gmra.mrb[0].mxu0 %v501_v10  ;;  %464 = vmatmul.mubr.bf16.vlgmr.msra.gmra.mrb[0].mxu1 %v502_v11 }
  0xf9   : > { %v461_v13 = vpop.f32.mrb[0].mxu0  ;;  %v465_v14 = vpop.f32.mrb[0].mxu1 }
  0xfa   : > { %v321_v15 = vadd.f32 %v461_v13, %v416_v12  ;;  %v337_v16 = vadd.f32 %v465_v14, %v416_v12  ;;  %v312_v17 = vpop.f32.mrb[1].mxu0  ;;  %v328_v18 = vpop.f32.mrb[1].mxu1 }
  0xfb   : > { %v313_v19 = vadd.f32 %v416_v12, %v312_v17  ;;  %v329_v20 = vadd.f32 %v416_v12, %v328_v18  ;;  %v462_v21 = vpop.f32.mrb[2].mxu0  ;;  %v466_v22 = vpop.f32.mrb[2].mxu1 }
  0xfc   : > { %345 = vst [vmem:[%s172_s14 + $0x10] sm:$0xff] %v321_v15  ;;  %349 = vst [vmem:[%s172_s14 + $0x30] sm:$0xff] %v337_v16  ;;  %v324_v23 = vadd.f32 %v462_v21, %v416_v12  ;;  %v340_v24 = vadd.f32 %v466_v22, %v416_v12  ;;  %v315_v25 = vpop.f32.mrb[3].mxu0  ;;  %v331_v26 = vpop.f32.mrb[3].mxu1 }
  0xfd   : > { %343 = vst [vmem:[%s172_s14] sm:$0xff] %v313_v19  ;;  %347 = vst [vmem:[%s172_s14 + $0x20] sm:$0xff] %v329_v20  ;;  %v316_v27 = vadd.f32 %v416_v12, %v315_v25  ;;  %v332_v28 = vadd.f32 %v416_v12, %v331_v26 }
  0xfe   : > { %346 = vst [vmem:[%s172_s14 + $0x18] sm:$0xff] %v324_v23  ;;  %350 = vst [vmem:[%s172_s14 + $0x38] sm:$0xff] %v340_v24 }
  0xff   : > { %344 = vst [vmem:[%s172_s14 + $0x8] sm:$0xff] %v316_v27  ;;  %348 = vst [vmem:[%s172_s14 + $0x28] sm:$0xff] %v332_v28 }
 0x100 PF: > { %s13_s12 = sadd.s32 1, %s509_s12  }
 0x101   : > { %p10_p4 = scmp.ge.s32.totalorder %s13_s12, 4  }
 0x103   :  { %12 = sbr.rel (!%p10_p4) target bundleno = 1 (0x1), region = 62 }

// kernel: _lambda_.9
= control target key start
LH: loop header
LB: loop body
LE: loop exit
PB: predicated region body
PF: predicated region fallthrough
CT: control target
= control target key end

     0   :  { %s807_s12 = smov 0   ;;  %s941_s0 = inlined_call_operand.vmem [shape: bf16[512,128], index: 0, kind: input, shape index: {}]   ;;  %s942_s1 = inlined_call_operand.vmem [shape: bf16[128,128], index: 1, kind: input, shape index: {}]   ;;  %s943_s2 = inlined_call_operand.vmem [shape: f32[1,128], index: 2, kind: input, shape index: {}]   ;;  %s944_s3 = inlined_call_operand.vmem [shape: f32[512,128], index: 3, kind: output, shape index: {}]  }
   0x1 LB: > { %s623_s13 = sadd.s32 4294967295, %s785_s12   ;;  %p627_p0 = scmp.ge.s32.totalorder %s785_s12, 1  ;;  %s785_s12 = sphi %s807_s12, %s13_s12  }
   0x2   : > { %p138_p1 = scmp.lt.s32.totalorder %s785_s12, 3 }
   0x4   : > { %p139_p2 = pnand %p627_p0, %p138_p1 }
   0x5   : > { %v755_v0 = vld [vmem:[%s942_s1] sm:$0xff] (!%p139_p2)   ;;  %s628_s16 = sshll.u32 (!%p139_p2), %s623_s13, 5  ;;  %v756_v1 = vld [vmem:[%s942_s1 + $0x8] sm:$0xff] (!%p139_p2)   ;;  %v757_v2 = vld [vmem:[%s942_s1 + $0x10] sm:$0xff] (!%p139_p2)  }
   0x6   : > { %142 = sbr.rel (%p139_p2) target bundleno = 280 (0x118), region = 32  ;;  %p163_p3 = scmp.lt.s32.totalorder (!%p139_p2), %s628_s16, 63  ;;  %683 = vmatprep.subr.bf16.mxu0 (!%p139_p2), %v755_v0  ;;  %731 = vmatprep.subr.bf16.mxu1 (!%p139_p2), %v755_v0  ;;  %v758_v3 = vld [vmem:[%s942_s1 + $0x18] sm:$0xff] (!%p139_p2)   ;;  %v759_v6 = vld [vmem:[%s942_s1 + $0x20] sm:$0xff] (!%p139_p2)   ;;  %v760_v7 = vld [vmem:[%s942_s1 + $0x28] sm:$0xff] (!%p139_p2)  }
   0x7   : > { %684 = vmatpush3.bf16.msra.mxu0 (!%p139_p2), %v755_v0  ;;  %739 = vmatpush3.bf16.msra.mxu1 (!%p139_p2), %v755_v0  ;;  %v761_v8 = vld [vmem:[%s942_s1 + $0x30] sm:$0xff] (!%p139_p2)   ;;  %v762_v9 = vld [vmem:[%s942_s1 + $0x38] sm:$0xff] (!%p139_p2)   ;;  %v867_v24 = vld [vmem:[%s943_s2] ss:$0 sm:$0xff] (!%p139_p2) }
   0x8   : > { %685 = vmatprep.subr.bf16.mxu0 (!%p139_p2), %v756_v1  ;;  %732 = vmatprep.subr.bf16.mxu1 (!%p139_p2), %v756_v1 }
   0xb   : > { %686 = vmatpush3.bf16.msra.mxu0 (!%p139_p2), %v756_v1  ;;  %740 = vmatpush3.bf16.msra.mxu1 (!%p139_p2), %v756_v1 }
   0xc   : > { %687 = vmatprep.subr.bf16.mxu0 (!%p139_p2), %v757_v2  ;;  %733 = vmatprep.subr.bf16.mxu1 (!%p139_p2), %v757_v2 }
   0xd   : > { %s946_s16 = smov (!%p163_p3, %s628_s16), 63 }
   0xe   : > { %s629_s21 = sshll.u32 %s946_s16, 2  ;;  %s631_s8 = sshll.u32 %s946_s16, 3 }
   0xf   : > { %s830_s24 = scalar_lea.vmem %s941_s0, %s629_s21  ;;  %688 = vmatpush3.bf16.msra.mxu0 %v757_v2  ;;  %741 = vmatpush3.bf16.msra.mxu1 %v757_v2  ;;  %s872_s14 = scalar_lea.vmem %s944_s3, %s631_s8 }
  0x10   : > { %v763_v4 = vld [vmem:[%s830_s24] sm:$0xff]   ;;  %689 = vmatprep.subr.bf16.mxu0 %v758_v3  ;;  %734 = vmatprep.subr.bf16.mxu1 %v758_v3  ;;  %v765_v10 = vld [vmem:[%s830_s24 + $0x8] sm:$0xff]   ;;  %v767_v12 = vld [vmem:[%s830_s24 + $0x10] sm:$0xff]  }
  0x11   : > { %v764_v5 = vld [vmem:[%s830_s24 + $0x40] sm:$0xff]   ;;  %699 = vmatprep.mubr.bf16.mxu0 %v763_v4  ;;  %v766_v11 = vld [vmem:[%s830_s24 + $0x48] sm:$0xff]   ;;  %v768_v13 = vld [vmem:[%s830_s24 + $0x50] sm:$0xff]  }
  0x12   : > { %715 = vmatprep.mubr.bf16.mxu1 %v764_v5  ;;  %v769_v14 = vld [vmem:[%s830_s24 + $0x18] sm:$0xff]   ;;  %v771_v16 = vld [vmem:[%s830_s24 + $0x20] sm:$0xff]   ;;  %v773_v18 = vld [vmem:[%s830_s24 + $0x28] sm:$0xff]  }
  0x13   : > { %690 = vmatpush3.bf16.msra.mxu0 %v758_v3  ;;  %742 = vmatpush3.bf16.msra.mxu1 %v758_v3  ;;  %v770_v15 = vld [vmem:[%s830_s24 + $0x58] sm:$0xff]   ;;  %v772_v17 = vld [vmem:[%s830_s24 + $0x60] sm:$0xff]   ;;  %v774_v19 = vld [vmem:[%s830_s24 + $0x68] sm:$0xff]  }
  0x14   : > { %691 = vmatprep.subr.bf16.mxu0 %v759_v6  ;;  %735 = vmatprep.subr.bf16.mxu1 %v759_v6  ;;  %v775_v20 = vld [vmem:[%s830_s24 + $0x30] sm:$0xff]   ;;  %v777_v22 = vld [vmem:[%s830_s24 + $0x38] sm:$0xff]  }
  0x15   : > { %v776_v21 = vld [vmem:[%s830_s24 + $0x70] sm:$0xff]   ;;  %v778_v23 = vld [vmem:[%s830_s24 + $0x78] sm:$0xff]  }
  0x17   : > { %692 = vmatpush3.bf16.msra.mxu0 %v759_v6  ;;  %743 = vmatpush3.bf16.msra.mxu1 %v759_v6 }
  0x18   : > { %693 = vmatprep.subr.bf16.mxu0 %v760_v7  ;;  %736 = vmatprep.subr.bf16.mxu1 %v760_v7 }
  0x1b   : > { %694 = vmatpush3.bf16.msra.mxu0 %v760_v7  ;;  %744 = vmatpush3.bf16.msra.mxu1 %v760_v7 }
  0x1c   : > { %695 = vmatprep.subr.bf16.mxu0 %v761_v8  ;;  %737 = vmatprep.subr.bf16.mxu1 %v761_v8 }
  0x1f   : > { %696 = vmatpush3.bf16.msra.mxu0 %v761_v8  ;;  %745 = vmatpush3.bf16.msra.mxu1 %v761_v8 }
  0x20   : > { %697 = vmatprep.subr.bf16.mxu0 %v762_v9  ;;  %738 = vmatprep.subr.bf16.mxu1 %v762_v9 }
  0x23   : > { %698 = vmatpush3.bf16.msra.mxu0 %v762_v9  ;;  %746 = vmatpush3.bf16.msra.mxu1 %v762_v9 }
  0x26   : > { %700 = vmatmul.mubr.bf16.vlgmr.msra.gmra.mrb[0].mxu0 %v765_v10  ;;  %716 = vmatmul.mubr.bf16.vlgmr.msra.gmra.mrb[0].mxu1 %v766_v11 }
  0x27   : > { %703 = vmatprep.mubr.bf16.mxu0 %v767_v12  ;;  %719 = vmatprep.mubr.bf16.mxu1 %v768_v13 }
  0x2e   : > { %704 = vmatmul.mubr.bf16.gmra.mrb[4].mxu0 %v769_v14  ;;  %720 = vmatmul.mubr.bf16.gmra.mrb[4].mxu1 %v770_v15 }
  0x2f   : > { %707 = vmatprep.mubr.bf16.mxu0 %v771_v16  ;;  %723 = vmatprep.mubr.bf16.mxu1 %v772_v17 }
  0x36   : > { %708 = vmatmul.mubr.bf16.gmra.mrb[8].mxu0 %v773_v18  ;;  %724 = vmatmul.mubr.bf16.gmra.mrb[8].mxu1 %v774_v19 }
  0x37   : > { %711 = vmatprep.mubr.bf16.mxu0 %v775_v20  ;;  %727 = vmatprep.mubr.bf16.mxu1 %v776_v21 }
  0x3e   : > { %712 = vmatmul.mubr.bf16.gmra.mrb[12].mxu0 %v777_v22  ;;  %728 = vmatmul.mubr.bf16.gmra.mrb[12].mxu1 %v778_v23 }
  0xf9   : > { %v701_v25 = vpop.f32.mrb[0].mxu0  ;;  %v717_v26 = vpop.f32.mrb[0].mxu1 }
  0xfa   : > { %v417_v27 = vadd.f32 %v701_v25, %v867_v24  ;;  %v481_v28 = vadd.f32 %v717_v26, %v867_v24  ;;  %v408_v29 = vpop.f32.mrb[1].mxu0  ;;  %v472_v30 = vpop.f32.mrb[1].mxu1 }
  0xfb   : > { %v409_v31 = vadd.f32 %v867_v24, %v408_v29  ;;  %v473_v32 = vadd.f32 %v867_v24, %v472_v30  ;;  %v702_v33 = vpop.f32.mrb[2].mxu0  ;;  %v718_v34 = vpop.f32.mrb[2].mxu1 }
  0xfc   : > { %537 = vst [vmem:[%s872_s14 + $0x10] sm:$0xff] %v417_v27  ;;  %553 = vst [vmem:[%s872_s14 + $0x90] sm:$0xff] %v481_v28  ;;  %v420_v35 = vadd.f32 %v702_v33, %v867_v24  ;;  %v484_v36 = vadd.f32 %v718_v34, %v867_v24  ;;  %v411_v37 = vpop.f32.mrb[3].mxu0  ;;  %v475_v38 = vpop.f32.mrb[3].mxu1 }
  0xfd   : > { %535 = vst [vmem:[%s872_s14] sm:$0xff] %v409_v31  ;;  %551 = vst [vmem:[%s872_s14 + $0x80] sm:$0xff] %v473_v32  ;;  %v412_v39 = vadd.f32 %v867_v24, %v411_v37  ;;  %v476_v40 = vadd.f32 %v867_v24, %v475_v38 }
  0xfe   : > { %538 = vst [vmem:[%s872_s14 + $0x18] sm:$0xff] %v420_v35  ;;  %554 = vst [vmem:[%s872_s14 + $0x98] sm:$0xff] %v484_v36 }
  0xff   : > { %536 = vst [vmem:[%s872_s14 + $0x8] sm:$0xff] %v412_v39  ;;  %552 = vst [vmem:[%s872_s14 + $0x88] sm:$0xff] %v476_v40 }
 0x101   : > { %v705_v41 = vpop.f32.mrb[4].mxu0  ;;  %v721_v42 = vpop.f32.mrb[4].mxu1 }
 0x102   : > { %v433_v43 = vadd.f32 %v705_v41, %v867_v24  ;;  %v497_v44 = vadd.f32 %v721_v42, %v867_v24  ;;  %v424_v45 = vpop.f32.mrb[5].mxu0  ;;  %v488_v46 = vpop.f32.mrb[5].mxu1 }
 0x103   : > { %v425_v47 = vadd.f32 %v867_v24, %v424_v45  ;;  %v489_v48 = vadd.f32 %v867_v24, %v488_v46  ;;  %v706_v49 = vpop.f32.mrb[6].mxu0  ;;  %v722_v50 = vpop.f32.mrb[6].mxu1 }
 0x104   : > { %541 = vst [vmem:[%s872_s14 + $0x30] sm:$0xff] %v433_v43  ;;  %557 = vst [vmem:[%s872_s14 + $0xb0] sm:$0xff] %v497_v44  ;;  %v436_v51 = vadd.f32 %v706_v49, %v867_v24  ;;  %v500_v52 = vadd.f32 %v722_v50, %v867_v24  ;;  %v427_v53 = vpop.f32.mrb[7].mxu0  ;;  %v491_v54 = vpop.f32.mrb[7].mxu1 }
 0x105   : > { %539 = vst [vmem:[%s872_s14 + $0x20] sm:$0xff] %v425_v47  ;;  %555 = vst [vmem:[%s872_s14 + $0xa0] sm:$0xff] %v489_v48  ;;  %v428_v55 = vadd.f32 %v867_v24, %v427_v53  ;;  %v492_v56 = vadd.f32 %v867_v24, %v491_v54 }
 0x106   : > { %542 = vst [vmem:[%s872_s14 + $0x38] sm:$0xff] %v436_v51  ;;  %558 = vst [vmem:[%s872_s14 + $0xb8] sm:$0xff] %v500_v52 }
 0x107   : > { %540 = vst [vmem:[%s872_s14 + $0x28] sm:$0xff] %v428_v55  ;;  %556 = vst [vmem:[%s872_s14 + $0xa8] sm:$0xff] %v492_v56 }
 0x109   : > { %v709_v57 = vpop.f32.mrb[8].mxu0  ;;  %v725_v58 = vpop.f32.mrb[8].mxu1 }
 0x10a   : > { %v449_v59 = vadd.f32 %v709_v57, %v867_v24  ;;  %v513_v60 = vadd.f32 %v725_v58, %v867_v24  ;;  %v440_v61 = vpop.f32.mrb[9].mxu0  ;;  %v504_v62 = vpop.f32.mrb[9].mxu1 }
 0x10b   : > { %v441_v63 = vadd.f32 %v867_v24, %v440_v61  ;;  %v505_v0 = vadd.f32 %v867_v24, %v504_v62  ;;  %v710_v1 = vpop.f32.mrb[10].mxu0  ;;  %v726_v2 = vpop.f32.mrb[10].mxu1 }
 0x10c   : > { %545 = vst [vmem:[%s872_s14 + $0x50] sm:$0xff] %v449_v59  ;;  %561 = vst [vmem:[%s872_s14 + $0xd0] sm:$0xff] %v513_v60  ;;  %v452_v3 = vadd.f32 %v710_v1, %v867_v24  ;;  %v516_v4 = vadd.f32 %v726_v2, %v867_v24  ;;  %v443_v5 = vpop.f32.mrb[11].mxu0  ;;  %v507_v6 = vpop.f32.mrb[11].mxu1 }
 0x10d   : > { %543 = vst [vmem:[%s872_s14 + $0x40] sm:$0xff] %v441_v63  ;;  %559 = vst [vmem:[%s872_s14 + $0xc0] sm:$0xff] %v505_v0  ;;  %v444_v7 = vadd.f32 %v867_v24, %v443_v5  ;;  %v508_v8 = vadd.f32 %v867_v24, %v507_v6 }
 0x10e   : > { %546 = vst [vmem:[%s872_s14 + $0x58] sm:$0xff] %v452_v3  ;;  %562 = vst [vmem:[%s872_s14 + $0xd8] sm:$0xff] %v516_v4 }
 0x10f   : > { %544 = vst [vmem:[%s872_s14 + $0x48] sm:$0xff] %v444_v7  ;;  %560 = vst [vmem:[%s872_s14 + $0xc8] sm:$0xff] %v508_v8 }
 0x111   : > { %v713_v9 = vpop.f32.mrb[12].mxu0  ;;  %v729_v10 = vpop.f32.mrb[12].mxu1 }
 0x112   : > { %v465_v11 = vadd.f32 %v713_v9, %v867_v24  ;;  %v529_v12 = vadd.f32 %v729_v10, %v867_v24  ;;  %v456_v13 = vpop.f32.mrb[13].mxu0  ;;  %v520_v14 = vpop.f32.mrb[13].mxu1 }
 0x113   : > { %v457_v15 = vadd.f32 %v867_v24, %v456_v13  ;;  %v521_v16 = vadd.f32 %v867_v24, %v520_v14  ;;  %v714_v17 = vpop.f32.mrb[14].mxu0  ;;  %v730_v18 = vpop.f32.mrb[14].mxu1 }
 0x114   : > { %549 = vst [vmem:[%s872_s14 + $0x70] sm:$0xff] %v465_v11  ;;  %565 = vst [vmem:[%s872_s14 + $0xf0] sm:$0xff] %v529_v12  ;;  %v468_v19 = vadd.f32 %v714_v17, %v867_v24  ;;  %v532_v20 = vadd.f32 %v730_v18, %v867_v24  ;;  %v459_v21 = vpop.f32.mrb[15].mxu0  ;;  %v523_v22 = vpop.f32.mrb[15].mxu1 }
 0x115   : > { %547 = vst [vmem:[%s872_s14 + $0x60] sm:$0xff] %v457_v15  ;;  %563 = vst [vmem:[%s872_s14 + $0xe0] sm:$0xff] %v521_v16  ;;  %v460_v23 = vadd.f32 %v867_v24, %v459_v21  ;;  %v524_v25 = vadd.f32 %v867_v24, %v523_v22 }
 0x116   : > { %550 = vst [vmem:[%s872_s14 + $0x78] sm:$0xff] %v468_v19  ;;  %566 = vst [vmem:[%s872_s14 + $0xf8] sm:$0xff] %v532_v20 }
 0x117   : > { %548 = vst [vmem:[%s872_s14 + $0x68] sm:$0xff] %v460_v23  ;;  %564 = vst [vmem:[%s872_s14 + $0xe8] sm:$0xff] %v524_v25 }
 0x118 PF: > { %s13_s12 = sadd.s32 1, %s785_s12  }
 0x119   : > { %p10_p4 = scmp.ge.s32.totalorder %s13_s12, 4  }
 0x11b   :  { %12 = sbr.rel (!%p10_p4) target bundleno = 1 (0x1), region = 62 }

// kernel: _lambda_.11
= control target key start
LH: loop header
LB: loop body
LE: loop exit
PB: predicated region body
PF: predicated region fallthrough
CT: control target
= control target key end

     0   :  { %s533_s12 = smov 0   ;;  %s608_s0 = inlined_call_operand.vmem [shape: bf16[32,256], index: 0, kind: input, shape index: {}]   ;;  %s609_s1 = inlined_call_operand.vmem [shape: bf16[256,128], index: 1, kind: input, shape index: {}]   ;;  %s610_s2 = inlined_call_operand.vmem [shape: f32[1,128], index: 2, kind: input, shape index: {}]   ;;  %s611_s3 = inlined_call_operand.vmem [shape: f32[32,128], index: 3, kind: output, shape index: {}]  }
   0x1 LB: > { %s424_s13 = sadd.s32 4294967295, %s511_s12   ;;  %p428_p0 = scmp.ge.s32.totalorder %s511_s12, 1  ;;  %s511_s12 = sphi %s533_s12, %s13_s12  }
   0x2   : > { %p139_p1 = scmp.lt.s32.totalorder %s511_s12, 3 }
   0x4   : > { %p140_p2 = pnand %p428_p0, %p139_p1 }
   0x5   : > { %v486_v0 = vld [vmem:[%s609_s1 + $0x40] sm:$0xff] (!%p140_p2)   ;;  %s429_s16 = sshll.u32 (!%p140_p2), %s424_s13, 1  ;;  %v488_v2 = vld [vmem:[%s609_s1 + $0x48] sm:$0xff] (!%p140_p2)   ;;  %v490_v4 = vld [vmem:[%s609_s1 + $0x50] sm:$0xff] (!%p140_p2)  }
   0x6   : > { %143 = sbr.rel (%p140_p2) target bundleno = 258 (0x102), region = 32  ;;  %v487_v1 = vld [vmem:[%s609_s1] sm:$0xff] (!%p140_p2)   ;;  %456 = vmatprep.subr.bf16.mxu0 (!%p140_p2), %v486_v0  ;;  %v489_v3 = vld [vmem:[%s609_s1 + $0x8] sm:$0xff] (!%p140_p2)   ;;  %p165_p3 = scmp.lt.s32.totalorder (!%p140_p2), %s429_s16, 3  ;;  %v491_v5 = vld [vmem:[%s609_s1 + $0x10] sm:$0xff] (!%p140_p2)  }
   0x7   : > { %457 = vmatpush3.bf16.msra.mxu0 (!%p140_p2), %v487_v1  ;;  %v492_v6 = vld [vmem:[%s609_s1 + $0x58] sm:$0xff] (!%p140_p2)   ;;  %v494_v8 = vld [vmem:[%s609_s1 + $0x60] sm:$0xff] (!%p140_p2)   ;;  %v496_v10 = vld [vmem:[%s609_s1 + $0x68] sm:$0xff] (!%p140_p2)  }
   0x8   : > { %458 = vmatprep.subr.bf16.mxu0 (!%p140_p2), %v488_v2  ;;  %v493_v7 = vld [vmem:[%s609_s1 + $0x18] sm:$0xff] (!%p140_p2)   ;;  %v495_v9 = vld [vmem:[%s609_s1 + $0x20] sm:$0xff] (!%p140_p2)   ;;  %v497_v12 = vld [vmem:[%s609_s1 + $0x28] sm:$0xff] (!%p140_p2)  }
   0x9   : > { %v498_v13 = vld [vmem:[%s609_s1 + $0x70] sm:$0xff] (!%p140_p2)   ;;  %v500_v15 = vld [vmem:[%s609_s1 + $0x78] sm:$0xff] (!%p140_p2)   ;;  %v434_v19 = vld [vmem:[%s610_s2] ss:$0 sm:$0xff] (!%p140_p2) }
   0xa   : > { %v499_v14 = vld [vmem:[%s609_s1 + $0x30] sm:$0xff] (!%p140_p2)   ;;  %v501_v16 = vld [vmem:[%s609_s1 + $0x38] sm:$0xff] (!%p140_p2)  }
   0xb   : > { %459 = vmatpush3.bf16.msra.mxu0 (!%p140_p2), %v489_v3 }
   0xc   : > { %460 = vmatprep.subr.bf16.mxu0 (!%p140_p2), %v490_v4 }
   0xd   : > { %s613_s16 = smov (!%p165_p3, %s429_s16), 3 }
   0xe   : > { %s455_s4 = sshll.u32 %s613_s16, 3 }
   0xf   : > { %461 = vmatpush3.bf16.msra.mxu0 %v491_v5  ;;  %s169_s9 = scalar_lea.vmem %s608_s0, %s455_s4  ;;  %s175_s30 = scalar_lea.vmem %s611_s3, %s455_s4 }
  0x10   : > { %462 = vmatprep.subr.bf16.mxu0 %v492_v6  ;;  %v504_v11 = vld [vmem:[%s169_s9 + $0x4] ss:$8 sps:$4 sm:$0xff]   ;;  %v502_v17 = vld [vmem:[%s169_s9] ss:$8 sps:$4 sm:$0xff]  }
  0x11   : > { %357 = vmatprep.mubr.bf16.mxu0 %v504_v11 }
  0x13   : > { %463 = vmatpush3.bf16.msra.mxu0 %v493_v7 }
  0x14   : > { %464 = vmatprep.subr.bf16.mxu0 %v494_v8 }
  0x17   : > { %465 = vmatpush3.bf16.msra.mxu0 %v495_v9 }
  0x18   : > { %466 = vmatprep.subr.bf16.mxu0 %v496_v10 }
  0x1b   : > { %467 = vmatpush3.bf16.msra.mxu0 %v497_v12 }
  0x1c   : > { %468 = vmatprep.subr.bf16.mxu0 %v498_v13 }
  0x1f   : > { %469 = vmatpush3.bf16.msra.mxu0 %v499_v14 }
  0x20   : > { %470 = vmatprep.subr.bf16.mxu0 %v500_v15 }
  0x23   : > { %471 = vmatpush3.bf16.msra.mxu0 %v501_v16 }
  0x26   : > { %358 = vmatmul.mubr.bf16.vlgmr.msra.gmra.mrb[0].mxu0 %v502_v17 }
  0xf9   : > { %v472_v18 = vpop.f32.mrb[0].mxu0 }
  0xfa   : > { %v473_v20 = vpop.f32.mrb[1].mxu0 }
  0xfb   : > { %v474_v21 = vadd.f32 %v473_v20, %v472_v18  ;;  %v475_v22 = vpop.f32.mrb[2].mxu0 }
  0xfc   : > { %v476_v23 = vpop.f32.mrb[3].mxu0 }
  0xfd   : > { %v360_v24 = vadd.f32 %v474_v21, %v434_v19  ;;  %v477_v25 = vadd.f32 %v476_v23, %v475_v22 }
  0xff   : > { %366 = vst [vmem:[%s175_s30] sm:$0xff] %v360_v24  ;;  %v363_v26 = vadd.f32 %v477_v25, %v434_v19 }
 0x101   : > { %367 = vst [vmem:[%s175_s30 + $0x8] sm:$0xff] %v363_v26 }
 0x102 PF: > { %s13_s12 = sadd.s32 1, %s511_s12  }
 0x103   : > { %p10_p4 = scmp.ge.s32.totalorder %s13_s12, 4  }
 0x105   :  { %12 = sbr.rel (!%p10_p4) target bundleno = 1 (0x1), region = 62 }

// kernel: _lambda_.12
= control target key start
LH: loop header
LB: loop body
LE: loop exit
PB: predicated region body
PF: predicated region fallthrough
CT: control target
= control target key end

     0   :  { %s624_s1 = inlined_call_operand.vmem [shape: bf16[512,128], index: 1, kind: input, shape index: {}]   ;;  %s625_s0 = inlined_call_operand.vmem [shape: bf16[8,512], index: 0, kind: input, shape index: {}]   ;;  %s626_s2 = inlined_call_operand.vmem [shape: f32[1,128], index: 2, kind: input, shape index: {}]   ;;  %s627_s3 = inlined_call_operand.vmem [shape: f32[8,128], index: 3, kind: output, shape index: {}]  }
   0x1   :  { %v460_v0 = vld [vmem:[%s624_s1 + $0x40] sm:$0xff]   ;;  %v464_v4 = vld [vmem:[%s624_s1 + $0x48] sm:$0xff]   ;;  %v468_v8 = vld [vmem:[%s624_s1 + $0x50] sm:$0xff]  }
   0x2   :  { %v461_v1 = vld [vmem:[%s624_s1 + $0xc0] sm:$0xff]   ;;  %416 = vmatprep.subr.bf16.mxu0 %v460_v0  ;;  %v465_v5 = vld [vmem:[%s624_s1 + $0xc8] sm:$0xff]   ;;  %v469_v9 = vld [vmem:[%s624_s1 + $0xd0] sm:$0xff]  }
   0x3   :  { %v462_v2 = vld [vmem:[%s624_s1] sm:$0xff]   ;;  %438 = vmatprep.subr.bf16.mxu1 %v461_v1  ;;  %v466_v6 = vld [vmem:[%s624_s1 + $0x8] sm:$0xff]   ;;  %v470_v10 = vld [vmem:[%s624_s1 + $0x10] sm:$0xff]  }
   0x4   :  { %v463_v3 = vld [vmem:[%s624_s1 + $0x80] sm:$0xff]   ;;  %417 = vmatpush3.bf16.msra.mxu0 %v462_v2  ;;  %v467_v7 = vld [vmem:[%s624_s1 + $0x88] sm:$0xff]   ;;  %v471_v11 = vld [vmem:[%s624_s1 + $0x90] sm:$0xff]  }
   0x5   :  { %439 = vmatpush3.bf16.msra.mxu1 %v463_v3  ;;  %418 = vmatprep.subr.bf16.mxu0 %v464_v4  ;;  %v472_v12 = vld [vmem:[%s624_s1 + $0x58] sm:$0xff]   ;;  %v476_v16 = vld [vmem:[%s624_s1 + $0x60] sm:$0xff]   ;;  %v480_v20 = vld [vmem:[%s624_s1 + $0x68] sm:$0xff]  }
   0x6   :  { %440 = vmatprep.subr.bf16.mxu1 %v465_v5  ;;  %v473_v13 = vld [vmem:[%s624_s1 + $0xd8] sm:$0xff]   ;;  %v477_v17 = vld [vmem:[%s624_s1 + $0xe0] sm:$0xff]   ;;  %v481_v21 = vld [vmem:[%s624_s1 + $0xe8] sm:$0xff]  }
   0x7   :  { %v474_v14 = vld [vmem:[%s624_s1 + $0x18] sm:$0xff]   ;;  %v478_v18 = vld [vmem:[%s624_s1 + $0x20] sm:$0xff]   ;;  %v482_v22 = vld [vmem:[%s624_s1 + $0x28] sm:$0xff]  }
   0x8   :  { %419 = vmatpush3.bf16.msra.mxu0 %v466_v6  ;;  %v475_v15 = vld [vmem:[%s624_s1 + $0x98] sm:$0xff]   ;;  %v479_v19 = vld [vmem:[%s624_s1 + $0xa0] sm:$0xff]   ;;  %v483_v23 = vld [vmem:[%s624_s1 + $0xa8] sm:$0xff]  }
   0x9   :  { %441 = vmatpush3.bf16.msra.mxu1 %v467_v7  ;;  %420 = vmatprep.subr.bf16.mxu0 %v468_v8  ;;  %v484_v24 = vld [vmem:[%s624_s1 + $0x70] sm:$0xff]   ;;  %v488_v28 = vld [vmem:[%s624_s1 + $0x78] sm:$0xff]   ;;  %v15_v32 = vld [vmem:[%s625_s0] sm:$0xff] }
   0xa   :  { %442 = vmatprep.subr.bf16.mxu1 %v469_v9  ;;  %v485_v25 = vld [vmem:[%s624_s1 + $0xf0] sm:$0xff]   ;;  %v489_v29 = vld [vmem:[%s624_s1 + $0xf8] sm:$0xff]   ;;  %v16_v33 = vld [vmem:[%s625_s0 + $0x8] sm:$0xff]  ;;  %v380_v34 = vcombine.low %v15_v32, %v15_v32  ;;  %v381_v35 = vcombine.high %v15_v32, %v15_v32 }
   0xb   :  { %v486_v26 = vld [vmem:[%s624_s1 + $0x30] sm:$0xff]   ;;  %v490_v30 = vld [vmem:[%s624_s1 + $0x38] sm:$0xff]   ;;  %v382_v36 = vcombine.low %v16_v33, %v16_v33  ;;  %v383_v37 = vcombine.high %v16_v33, %v16_v33  ;;  %v379_v40 = vld [vmem:[%s626_s2] ss:$0 sm:$0xff] }
   0xc   :  { %421 = vmatpush3.bf16.msra.mxu0 %v470_v10  ;;  %v487_v27 = vld [vmem:[%s624_s1 + $0xb0] sm:$0xff]   ;;  %v491_v31 = vld [vmem:[%s624_s1 + $0xb8] sm:$0xff]   ;;  %326 = vmatprep.mubr.bf16.mxu0 %v381_v35 }
   0xd   :  { %443 = vmatpush3.bf16.msra.mxu1 %v471_v11  ;;  %422 = vmatprep.subr.bf16.mxu0 %v472_v12 }
   0xe   :  { %444 = vmatprep.subr.bf16.mxu1 %v473_v13  ;;  %366 = vmatprep.mubr.bf16.mxu1 %v383_v37 }
  0x10   :  { %423 = vmatpush3.bf16.msra.mxu0 %v474_v14 }
  0x11   :  { %445 = vmatpush3.bf16.msra.mxu1 %v475_v15  ;;  %424 = vmatprep.subr.bf16.mxu0 %v476_v16 }
  0x12   :  { %446 = vmatprep.subr.bf16.mxu1 %v477_v17 }
  0x14   :  { %425 = vmatpush3.bf16.msra.mxu0 %v478_v18 }
  0x15   :  { %447 = vmatpush3.bf16.msra.mxu1 %v479_v19  ;;  %426 = vmatprep.subr.bf16.mxu0 %v480_v20 }
  0x16   :  { %448 = vmatprep.subr.bf16.mxu1 %v481_v21 }
  0x18   :  { %427 = vmatpush3.bf16.msra.mxu0 %v482_v22 }
  0x19   :  { %449 = vmatpush3.bf16.msra.mxu1 %v483_v23  ;;  %428 = vmatprep.subr.bf16.mxu0 %v484_v24 }
  0x1a   :  { %450 = vmatprep.subr.bf16.mxu1 %v485_v25 }
  0x1c   :  { %429 = vmatpush3.bf16.msra.mxu0 %v486_v26 }
  0x1d   :  { %451 = vmatpush3.bf16.msra.mxu1 %v487_v27  ;;  %430 = vmatprep.subr.bf16.mxu0 %v488_v28 }
  0x1e   :  { %452 = vmatprep.subr.bf16.mxu1 %v489_v29 }
  0x20   :  { %431 = vmatpush3.bf16.msra.mxu0 %v490_v30 }
  0x21   :  { %453 = vmatpush3.bf16.msra.mxu1 %v491_v31 }
  0x23   :  { %327 = vmatmul.mubr.bf16.vlgmr.msra.gmra.mrb[0].mxu0 %v380_v34 }
  0x24   :  { %367 = vmatmul.mubr.bf16.vlgmr.msra.gmra.mrb[0].mxu1 %v382_v36 }
  0xf6   :  { %v432_v38 = vpop.f32.mrb[0].mxu0 }
  0xf7   :  { %v454_v39 = vpop.f32.mrb[0].mxu1  ;;  %v433_v41 = vpop.f32.mrb[1].mxu0 }
  0xf8   :  { %v455_v42 = vpop.f32.mrb[1].mxu1  ;;  %v434_v43 = vadd.f32 %v433_v41, %v432_v38  ;;  %v435_v45 = vpop.f32.mrb[2].mxu0 }
  0xf9   :  { %v456_v44 = vadd.f32 %v455_v42, %v454_v39  ;;  %v457_v46 = vpop.f32.mrb[2].mxu1  ;;  %v436_v47 = vpop.f32.mrb[3].mxu0 }
  0xfa   :  { %v458_v48 = vpop.f32.mrb[3].mxu1  ;;  %v329_v49 = vadd.f32 %v434_v43, %v379_v40 }
  0xfc   :  { %v369_v50 = vadd.f32 %v456_v44, %v329_v49 }
  0xfe   :  { %374 = vst [vmem:[%s627_s3] sm:$0xff] %v369_v50 }

// kernel: _lambda_.13
= control target key start
LH: loop header
LB: loop body
LE: loop exit
PB: predicated region body
PF: predicated region fallthrough
CT: control target
= control target key end

     0   :  { %v1187_v22 = vmov 1966171168   ;;  %v162_v24 = vlaneseq  ;;  %s1489_s1 = inlined_call_operand.vmem [shape: bf16[1024,128], index: 1, kind: input, shape index: {}]   ;;  %s1490_s0 = inlined_call_operand.vmem [shape: bf16[2,1024], index: 0, kind: input, shape index: {}]   ;;  %s1491_s3 = inlined_call_operand.vmem [shape: bf16[128,256], index: 3, kind: input, shape index: {}]   ;;  %s1492_s2 = inlined_call_operand.vmem [shape: f32[1,128], index: 2, kind: input, shape index: {}]   ;;  %s1493_s4 = inlined_call_operand.vmem [shape: f32[1,256], index: 4, kind: input, shape index: {}]   ;;  %s1494_s5 = inlined_call_operand.vmem [shape: f32[2,256], index: 5, kind: output, shape index: {}]  }
   0x1   :  { %v1098_v0 = vld [vmem:[%s1489_s1 + $0x40] sm:$0xff]   ;;  %v1102_v4 = vld [vmem:[%s1489_s1 + $0x48] sm:$0xff]   ;;  %v1106_v8 = vld [vmem:[%s1489_s1 + $0x50] sm:$0xff]   ;;  %v160_v23 = vunpack.c.l.s4 %v1187_v22 }
   0x2   :  { %v1099_v1 = vld [vmem:[%s1489_s1 + $0xc0] sm:$0xff]   ;;  %1008 = vmatprep.subr.bf16.mxu0 %v1098_v0  ;;  %v1103_v5 = vld [vmem:[%s1489_s1 + $0xc8] sm:$0xff]   ;;  %v1107_v9 = vld [vmem:[%s1489_s1 + $0xd0] sm:$0xff]   ;;  %v1297_v30 = vshrl.u32 %v162_v24, 7 }
   0x3   :  { %v1100_v2 = vld [vmem:[%s1489_s1] sm:$0xff]   ;;  %1030 = vmatprep.subr.bf16.mxu1 %v1099_v1  ;;  %v1104_v6 = vld [vmem:[%s1489_s1 + $0x8] sm:$0xff]   ;;  %v1108_v10 = vld [vmem:[%s1489_s1 + $0x10] sm:$0xff]   ;;  %v161_v29 = vunpack.c.0.s8 %v160_v23 }
   0x4   :  { %v1101_v3 = vld [vmem:[%s1489_s1 + $0x80] sm:$0xff]   ;;  %1009 = vmatpush3.bf16.msra.mxu0 %v1100_v2  ;;  %v1105_v7 = vld [vmem:[%s1489_s1 + $0x88] sm:$0xff]   ;;  %v1109_v11 = vld [vmem:[%s1489_s1 + $0x90] sm:$0xff]  }
   0x5   :  { %1031 = vmatpush3.bf16.msra.mxu1 %v1101_v3  ;;  %1010 = vmatprep.subr.bf16.mxu0 %v1102_v4  ;;  %v1110_v12 = vld [vmem:[%s1489_s1 + $0x58] sm:$0xff]   ;;  %v1114_v16 = vld [vmem:[%s1489_s1 + $0x60] sm:$0xff]   ;;  %v1118_v20 = vld [vmem:[%s1489_s1 + $0x68] sm:$0xff]   ;;  %v1312_v35 = vsub.s32 %v161_v29, %v1297_v30 }
   0x6   :  { %1032 = vmatprep.subr.bf16.mxu1 %v1103_v5  ;;  %v1111_v13 = vld [vmem:[%s1489_s1 + $0xd8] sm:$0xff]   ;;  %v1115_v17 = vld [vmem:[%s1489_s1 + $0xe0] sm:$0xff]   ;;  %v1119_v21 = vld [vmem:[%s1489_s1 + $0xe8] sm:$0xff]  }
   0x7   :  { %v1112_v14 = vld [vmem:[%s1489_s1 + $0x18] sm:$0xff]   ;;  %v1116_v18 = vld [vmem:[%s1489_s1 + $0x20] sm:$0xff]   ;;  %v1120_v25 = vld [vmem:[%s1489_s1 + $0x28] sm:$0xff]  }
   0x8   :  { %1011 = vmatpush3.bf16.msra.mxu0 %v1104_v6  ;;  %v1113_v15 = vld [vmem:[%s1489_s1 + $0x98] sm:$0xff]   ;;  %v1117_v19 = vld [vmem:[%s1489_s1 + $0xa0] sm:$0xff]   ;;  %v1121_v26 = vld [vmem:[%s1489_s1 + $0xa8] sm:$0xff]  }
   0x9   :  { %1033 = vmatpush3.bf16.msra.mxu1 %v1105_v7  ;;  %1012 = vmatprep.subr.bf16.mxu0 %v1106_v8  ;;  %v1122_v27 = vld [vmem:[%s1489_s1 + $0x70] sm:$0xff]   ;;  %v1126_v33 = vld [vmem:[%s1489_s1 + $0x78] sm:$0xff]   ;;  %v21_v38 = vld [vmem:[%s1490_s0] sm:$0xff] }
   0xa   :  { %1034 = vmatprep.subr.bf16.mxu1 %v1107_v9  ;;  %v1123_v28 = vld [vmem:[%s1489_s1 + $0xf0] sm:$0xff]   ;;  %v1127_v34 = vld [vmem:[%s1489_s1 + $0xf8] sm:$0xff]   ;;  %v158_v39 = vcombine.high %v21_v38, %v21_v38  ;;  %v165_v40 = vrot.slane %v21_v38, %v1312_v35  ;;  %v1131_v41 = vld [vmem:[%s1489_s1 + $0x140] sm:$0xff]  }
   0xb   :  { %v1124_v31 = vld [vmem:[%s1489_s1 + $0x30] sm:$0xff]   ;;  %v1128_v36 = vld [vmem:[%s1489_s1 + $0x38] sm:$0xff]   ;;  %v1132_v42 = vld [vmem:[%s1489_s1 + $0x1c0] sm:$0xff]  }
   0xc   :  { %1013 = vmatpush3.bf16.msra.mxu0 %v1108_v10  ;;  %v1125_v32 = vld [vmem:[%s1489_s1 + $0xb0] sm:$0xff]   ;;  %v1129_v37 = vld [vmem:[%s1489_s1 + $0xb8] sm:$0xff]   ;;  %v173_v43 = vcombine.high %v165_v40, %v165_v40  ;;  %v181_v44 = vrot.slane %v165_v40, %v1312_v35  ;;  %v1332_v45 = vrot.slane %v158_v39, %v1312_v35  ;;  %v1133_v47 = vld [vmem:[%s1489_s1 + $0x100] sm:$0xff]  }
   0xd   :  { %1035 = vmatpush3.bf16.msra.mxu1 %v1109_v11  ;;  %1014 = vmatprep.subr.bf16.mxu0 %v1110_v12  ;;  %v1135_v50 = vld [vmem:[%s1489_s1 + $0x148] sm:$0xff]   ;;  %v1134_v52 = vld [vmem:[%s1489_s1 + $0x180] sm:$0xff]   ;;  %v1139_v57 = vld [vmem:[%s1489_s1 + $0x150] sm:$0xff]  }
   0xe   :  { %1036 = vmatprep.subr.bf16.mxu1 %v1111_v13  ;;  %v195_v46 = vrot.slane %v173_v43, %v1312_v35  ;;  %v174_v48 = vcombine.high %v1332_v45, %v1332_v45  ;;  %v203_v49 = vcombine.high %v181_v44, %v181_v44  ;;  %v1136_v54 = vld [vmem:[%s1489_s1 + $0x1c8] sm:$0xff]   ;;  %v1140_v59 = vld [vmem:[%s1489_s1 + $0x1d0] sm:$0xff]   ;;  %v1143_v61 = vld [vmem:[%s1489_s1 + $0x158] sm:$0xff]  }
   0xf   :  { %v1137_v55 = vld [vmem:[%s1489_s1 + $0x108] sm:$0xff]   ;;  %v1141_v60 = vld [vmem:[%s1489_s1 + $0x110] sm:$0xff]   ;;  %v1144_v63 = vld [vmem:[%s1489_s1 + $0x1d8] sm:$0xff]  }
  0x10   :  { %1015 = vmatpush3.bf16.msra.mxu0 %v1112_v14  ;;  %631 = vmatprep.mubr.bf16.mxu0 %v195_v46  ;;  %v205_v51 = vcombine.high %v195_v46, %v195_v46  ;;  %v202_v53 = vrot.slane %v174_v48, %v1312_v35  ;;  %v1138_v58 = vld [vmem:[%s1489_s1 + $0x188] sm:$0xff]   ;;  %v1142_v62 = vld [vmem:[%s1489_s1 + $0x190] sm:$0xff]   ;;  %v1145_v0 = vld [vmem:[%s1489_s1 + $0x118] sm:$0xff]  }
  0x11   :  { %1037 = vmatpush3.bf16.msra.mxu1 %v1113_v15  ;;  %1016 = vmatprep.subr.bf16.mxu0 %v1114_v16  ;;  %v1147_v1 = vld [vmem:[%s1489_s1 + $0x160] sm:$0xff]   ;;  %v1146_v2 = vld [vmem:[%s1489_s1 + $0x198] sm:$0xff]   ;;  %v1151_v5 = vld [vmem:[%s1489_s1 + $0x168] sm:$0xff]  }
  0x12   :  { %1038 = vmatprep.subr.bf16.mxu1 %v1115_v17  ;;  %671 = vmatprep.mubr.bf16.mxu1 %v205_v51  ;;  %v206_v56 = vcombine.high %v202_v53, %v202_v53  ;;  %v1148_v3 = vld [vmem:[%s1489_s1 + $0x1e0] sm:$0xff]   ;;  %v1152_v7 = vld [vmem:[%s1489_s1 + $0x1e8] sm:$0xff]   ;;  %v1155_v9 = vld [vmem:[%s1489_s1 + $0x170] sm:$0xff]   ;;  %v188_v17 = vrot.slane %v1332_v45, %v1312_v35 }
  0x13   :  { %v1149_v4 = vld [vmem:[%s1489_s1 + $0x120] sm:$0xff]   ;;  %v1153_v8 = vld [vmem:[%s1489_s1 + $0x128] sm:$0xff]   ;;  %v1156_v11 = vld [vmem:[%s1489_s1 + $0x1f0] sm:$0xff]  }
  0x14   :  { %1017 = vmatpush3.bf16.msra.mxu0 %v1116_v18  ;;  %v1150_v6 = vld [vmem:[%s1489_s1 + $0x1a0] sm:$0xff]   ;;  %v1154_v10 = vld [vmem:[%s1489_s1 + $0x1a8] sm:$0xff]   ;;  %v1157_v12 = vld [vmem:[%s1489_s1 + $0x130] sm:$0xff]  }
  0x15   :  { %1039 = vmatpush3.bf16.msra.mxu1 %v1117_v19  ;;  %1018 = vmatprep.subr.bf16.mxu0 %v1118_v20  ;;  %v1159_v13 = vld [vmem:[%s1489_s1 + $0x178] sm:$0xff]   ;;  %v1158_v14 = vld [vmem:[%s1489_s1 + $0x1b0] sm:$0xff]   ;;  %v204_v19 = vcombine.high %v188_v17, %v188_v17  ;;  %v1163_v20 = vld [vmem:[%s1491_s3] ss:$8 sps:$4 sm:$0xff]  }
  0x16   :  { %1040 = vmatprep.subr.bf16.mxu1 %v1119_v21  ;;  %v1160_v15 = vld [vmem:[%s1489_s1 + $0x1f8] sm:$0xff]   ;;  %v1165_v21 = vld [vmem:[%s1491_s3 + $0x4] ss:$8 sps:$4 sm:$0xff]   ;;  %v1175_v29 = vld [vmem:[%s1491_s3 + $0x40] ss:$8 sps:$4 sm:$0xff]  }
  0x17   :  { %v1161_v16 = vld [vmem:[%s1489_s1 + $0x138] sm:$0xff]   ;;  %v1171_v24 = vld [vmem:[%s1491_s3 + $0x24] ss:$8 sps:$4 sm:$0xff]   ;;  %v926_v39 = vld [vmem:[%s1492_s2] ss:$0 sm:$0xff] }
  0x18   :  { %1019 = vmatpush3.bf16.msra.mxu0 %v1120_v25  ;;  %v1162_v18 = vld [vmem:[%s1489_s1 + $0x1b8] sm:$0xff]   ;;  %v1169_v25 = vld [vmem:[%s1491_s3 + $0x20] ss:$8 sps:$4 sm:$0xff]  }
  0x19   :  { %1041 = vmatpush3.bf16.msra.mxu1 %v1121_v26  ;;  %1020 = vmatprep.subr.bf16.mxu0 %v1122_v27  ;;  %v1168_v22 = vld [vmem:[%s1491_s3 + $0x14] ss:$8 sps:$4 sm:$0xff]   ;;  %v1166_v23 = vld [vmem:[%s1491_s3 + $0x10] ss:$8 sps:$4 sm:$0xff]  }
  0x1a   :  { %1042 = vmatprep.subr.bf16.mxu1 %v1123_v28  ;;  %v1174_v26 = vld [vmem:[%s1491_s3 + $0x34] ss:$8 sps:$4 sm:$0xff]   ;;  %v1172_v27 = vld [vmem:[%s1491_s3 + $0x30] ss:$8 sps:$4 sm:$0xff]   ;;  %v1177_v28 = vld [vmem:[%s1491_s3 + $0x44] ss:$8 sps:$4 sm:$0xff]  }
  0x1b   :  { %v1186_v35 = vld [vmem:[%s1491_s3 + $0x74] ss:$8 sps:$4 sm:$0xff]  }
  0x1c   :  { %1021 = vmatpush3.bf16.msra.mxu0 %v1124_v31  ;;  %v1180_v31 = vld [vmem:[%s1491_s3 + $0x54] ss:$8 sps:$4 sm:$0xff]  }
  0x1d   :  { %1043 = vmatpush3.bf16.msra.mxu1 %v1125_v32  ;;  %1022 = vmatprep.subr.bf16.mxu0 %v1126_v33  ;;  %v1178_v32 = vld [vmem:[%s1491_s3 + $0x50] ss:$8 sps:$4 sm:$0xff]   ;;  %v1183_v33 = vld [vmem:[%s1491_s3 + $0x64] ss:$8 sps:$4 sm:$0xff]  }
  0x1e   :  { %1044 = vmatprep.subr.bf16.mxu1 %v1127_v34  ;;  %v1181_v34 = vld [vmem:[%s1491_s3 + $0x60] ss:$8 sps:$4 sm:$0xff]  }
  0x20   :  { %1023 = vmatpush3.bf16.msra.mxu0 %v1128_v36  ;;  %v1184_v36 = vld [vmem:[%s1491_s3 + $0x70] ss:$8 sps:$4 sm:$0xff]  }
  0x21   :  { %1045 = vmatpush3.bf16.msra.mxu1 %v1129_v37  ;;  %1052 = vmatprep.subr.bf16.mxu0 %v1131_v41  ;;  %v1188_v37 = vmov 0  }
  0x22   :  { %1074 = vmatprep.subr.bf16.mxu1 %v1132_v42 }
  0x23   :  { %632 = vmatmul.mubr.bf16.vlgmr.msra.gmra.mrb[0].mxu0 %v181_v44 }
  0x24   :  { %1053 = vmatpush3.bf16.msra.mxu0 %v1133_v47  ;;  %672 = vmatmul.mubr.bf16.vlgmr.msra.gmra.mrb[0].mxu1 %v203_v49 }
  0x25   :  { %1054 = vmatprep.subr.bf16.mxu0 %v1135_v50  ;;  %1075 = vmatpush3.bf16.msra.mxu1 %v1134_v52 }
  0x26   :  { %711 = vmatprep.mubr.bf16.mxu0 %v202_v53  ;;  %1076 = vmatprep.subr.bf16.mxu1 %v1136_v54 }
  0x27   :  { %751 = vmatprep.mubr.bf16.mxu1 %v206_v56 }
  0x28   :  { %1055 = vmatpush3.bf16.msra.mxu0 %v1137_v55 }
  0x29   :  { %1056 = vmatprep.subr.bf16.mxu0 %v1139_v57  ;;  %1077 = vmatpush3.bf16.msra.mxu1 %v1138_v58 }
  0x2a   :  { %1078 = vmatprep.subr.bf16.mxu1 %v1140_v59 }
  0x2c   :  { %1057 = vmatpush3.bf16.msra.mxu0 %v1141_v60 }
  0x2d   :  { %1058 = vmatprep.subr.bf16.mxu0 %v1143_v61  ;;  %1079 = vmatpush3.bf16.msra.mxu1 %v1142_v62 }
  0x2e   :  { %1080 = vmatprep.subr.bf16.mxu1 %v1144_v63 }
  0x30   :  { %1059 = vmatpush3.bf16.msra.mxu0 %v1145_v0 }
  0x31   :  { %1060 = vmatprep.subr.bf16.mxu0 %v1147_v1  ;;  %1081 = vmatpush3.bf16.msra.mxu1 %v1146_v2  ;;  %v781_v1 = vsub.s32 0, %v1297_v30  ;;  %v777_v2 = vld [vmem:[%s1493_s4] sm:$0x3] }
  0x32   :  { %1082 = vmatprep.subr.bf16.mxu1 %v1148_v3  ;;  %v785_v3 = vsub.s32 1, %v1297_v30 }
  0x34   :  { %1061 = vmatpush3.bf16.msra.mxu0 %v1149_v4  ;;  %v782_v4 = vrot.slane %v777_v2, %v781_v1 }
  0x35   :  { %1062 = vmatprep.subr.bf16.mxu0 %v1151_v5  ;;  %1083 = vmatpush3.bf16.msra.mxu1 %v1150_v6  ;;  %v786_v5 = vrot.slane %v777_v2, %v785_v3 }
  0x36   :  { %1084 = vmatprep.subr.bf16.mxu1 %v1152_v7 }
  0x38   :  { %1063 = vmatpush3.bf16.msra.mxu0 %v1153_v8 }
  0x39   :  { %1064 = vmatprep.subr.bf16.mxu0 %v1155_v9  ;;  %1085 = vmatpush3.bf16.msra.mxu1 %v1154_v10 }
  0x3a   :  { %1086 = vmatprep.subr.bf16.mxu1 %v1156_v11 }
  0x3c   :  { %1065 = vmatpush3.bf16.msra.mxu0 %v1157_v12 }
  0x3d   :  { %1066 = vmatprep.subr.bf16.mxu0 %v1159_v13  ;;  %1087 = vmatpush3.bf16.msra.mxu1 %v1158_v14 }
  0x3e   :  { %1088 = vmatprep.subr.bf16.mxu1 %v1160_v15 }
  0x40   :  { %1067 = vmatpush3.bf16.msra.mxu0 %v1161_v16 }
  0x41   :  { %1089 = vmatpush3.bf16.msra.mxu1 %v1162_v18  ;;  %869 = vmatprep.subr.bf16.mxu0 %v1165_v21 }
  0x43   :  { %712 = vmatmul.mubr.bf16.vlgmr.msra.gmra.mrb[4].mxu0 %v188_v17 }
  0x44   :  { %752 = vmatmul.mubr.bf16.vlgmr.msra.gmra.mrb[4].mxu1 %v204_v19  ;;  %870 = vmatpush1.bf16.msra.mxu0 %v1163_v20 }
  0x45   :  { %871 = vmatprep.subr.bf16.mxu0 %v1168_v22  ;;  %901 = vmatprep.mubr.bf16.mxu0 %v1188_v37 }
  0x48   :  { %872 = vmatpush1.bf16.msra.mxu0 %v1166_v23 }
  0x49   :  { %873 = vmatprep.subr.bf16.mxu0 %v1171_v24 }
  0x4c   :  { %874 = vmatpush1.bf16.msra.mxu0 %v1169_v25 }
  0x4d   :  { %875 = vmatprep.subr.bf16.mxu0 %v1174_v26 }
  0x50   :  { %876 = vmatpush1.bf16.msra.mxu0 %v1172_v27 }
  0x51   :  { %877 = vmatprep.subr.bf16.mxu0 %v1177_v28 }
  0x54   :  { %878 = vmatpush1.bf16.msra.mxu0 %v1175_v29 }
  0x55   :  { %879 = vmatprep.subr.bf16.mxu0 %v1180_v31 }
  0x58   :  { %880 = vmatpush1.bf16.msra.mxu0 %v1178_v32 }
  0x59   :  { %881 = vmatprep.subr.bf16.mxu0 %v1183_v33 }
  0x5c   :  { %882 = vmatpush1.bf16.msra.mxu0 %v1181_v34 }
  0x5d   :  { %883 = vmatprep.subr.bf16.mxu0 %v1186_v35 }
  0x60   :  { %884 = vmatpush1.bf16.msra.mxu0 %v1184_v36 }
  0xf6   :  { %v1024_v38 = vpop.f32.mrb[0].mxu0 }
  0xf7   :  { %v1025_v40 = vpop.f32.mrb[1].mxu0  ;;  %v1046_v41 = vpop.f32.mrb[0].mxu1 }
  0xf8   :  { %v1026_v42 = vadd.f32 %v1025_v40, %v1024_v38  ;;  %v1027_v43 = vpop.f32.mrb[2].mxu0  ;;  %v1047_v44 = vpop.f32.mrb[1].mxu1 }
  0xf9   :  { %v1028_v45 = vpop.f32.mrb[3].mxu0  ;;  %v1048_v47 = vadd.f32 %v1047_v44, %v1046_v41  ;;  %v1049_v48 = vpop.f32.mrb[2].mxu1 }
  0xfa   :  { %v634_v46 = vadd.f32 %v1026_v42, %v926_v39  ;;  %v1050_v49 = vpop.f32.mrb[3].mxu1 }
  0xfc   :  { %v674_v50 = vadd.f32 %v1048_v47, %v634_v46 }
 0x116   :  { %v1068_v51 = vpop.f32.mrb[4].mxu0 }
 0x117   :  { %v1069_v52 = vpop.f32.mrb[5].mxu0  ;;  %v1090_v53 = vpop.f32.mrb[4].mxu1 }
 0x118   :  { %v1070_v54 = vadd.f32 %v1069_v52, %v1068_v51  ;;  %v1071_v55 = vpop.f32.mrb[6].mxu0  ;;  %v1091_v56 = vpop.f32.mrb[5].mxu1 }
 0x119   :  { %v1072_v57 = vpop.f32.mrb[7].mxu0  ;;  %v1092_v59 = vadd.f32 %v1091_v56, %v1090_v53  ;;  %v1093_v60 = vpop.f32.mrb[6].mxu1 }
 0x11a   :  { %v714_v58 = vadd.f32 %v1070_v54, %v674_v50  ;;  %v1094_v61 = vpop.f32.mrb[7].mxu1 }
 0x11c   :  { %v754_v62 = vadd.f32 %v1092_v59, %v714_v58 }
 0x11e   :  { %v759_v63 = vmax.f32 %v754_v62, 0.0 }
 0x120   :  { %v760_v0 = vpack.c.bf16 %v759_v63, %v759_v63 }
 0x122   :  { %902 = vmatmul.mubr.bf16.vlgmr.msra.gmra.mrb[8].mxu0 %v760_v0 }
 0x1f5   :  { %v903_v6 = vpop.f32.mrb[8].mxu0 }
 0x1f6   :  { %v904_v7 = vadd.f32 %v903_v6, %v782_v4  ;;  %v905_v8 = vpop.f32.mrb[9].mxu0 }
 0x1f7   :  { %v906_v9 = vadd.f32 %v905_v8, %v786_v5  ;;  %v907_v10 = vpop.f32.mrb[10].mxu0 }
 0x1f8   :  { %v908_v11 = vpop.f32.mrb[11].mxu0 }
 0x1f9   :  { %v912_v12 = vcombine.low %v904_v7, %v906_v9 }
 0x1fb   :  { %1007 = vst.sshfl [vmem:[%s1494_s5] sm:$0x33 pattern:$0x76325410] %v912_v12 }

// kernel: _lambda_.14
= control target key start
LH: loop header
LB: loop body
LE: loop exit
PB: predicated region body
PF: predicated region fallthrough
CT: control target
= control target key end

     0   :  { %s875_s12 = smov 0   ;;  %s877_s13 = smov 0   ;;  %s953_s0 = inlined_call_operand.vmem [shape: bf16[4,8,512], index: 0, kind: input, shape index: {}]   ;;  %s954_s1 = inlined_call_operand.vmem [shape: bf16[4,512,128], index: 1, kind: input, shape index: {}]   ;;  %s955_s2 = inlined_call_operand.vmem [shape: f32[1,128], index: 2, kind: input, shape index: {}]   ;;  %s956_s3 = inlined_call_operand.vmem [shape: f32[4,8,128], index: 3, kind: output, shape index: {}]  }
   0x1   :  { %s879_s14 = smov 0  }
   0x2 LB: > { %s25_s15 = sadd.s32 1, %s849_s13  ;;  %p680_p0 = scmp.ge.s32.totalorder %s853_s14, 1  ;;  %s853_s14 = sphi %s879_s14, %s13_s14   ;;  %s849_s13 = sphi %s877_s13, %s958_s13   ;;  %s845_s12 = sphi %s875_s12, %s957_s12  }
   0x3   : > { %p27_p1 = scmp.ge.s32.totalorder %s25_s15, 4  ;;  %p167_p2 = scmp.lt.s32.totalorder %s853_s14, 5 }
   0x5   : > { %s960_s15 = smov (%p27_p1, %s25_s15), 0  ;;  %p168_p3 = pnand %p680_p0, %p167_p2 }
   0x6   : > { %p202_p4 = scmp.lt.s32.totalorder (!%p168_p3), %s845_s12, 3  ;;  %v686_v40 = vld [vmem:[%s955_s2] ss:$0 sm:$0xff] (!%p168_p3) }
   0x7   : > { %171 = sbr.rel (%p168_p3) target bundleno = 271 (0x10f), region = 32 }
   0xe   : > { %s962_s12 = smov (!%p202_p4, %s845_s12), 3 }
   0xf   : > { %s726_s16 = sshll.u32 %s962_s12, 8  ;;  %s725_s20 = sshll.u32 %s962_s12, 4 }
  0x10   : > { %s899_s19 = scalar_lea.vmem %s954_s1, %s726_s16  ;;  %s210_s23 = scalar_lea.vmem %s953_s0, %s725_s20 }
  0x11   : > { %v795_v0 = vld [vmem:[%s899_s19 + $0x40] sm:$0xff]   ;;  %v799_v4 = vld [vmem:[%s899_s19 + $0x48] sm:$0xff]   ;;  %v803_v8 = vld [vmem:[%s899_s19 + $0x50] sm:$0xff]   ;;  %s685_s26 = sshll.u32 %s962_s12, 3 }
  0x12   : > { %v796_v1 = vld [vmem:[%s899_s19 + $0xc0] sm:$0xff]   ;;  %727 = vmatprep.subr.bf16.mxu0 %v795_v0  ;;  %v800_v5 = vld [vmem:[%s899_s19 + $0xc8] sm:$0xff]   ;;  %v804_v9 = vld [vmem:[%s899_s19 + $0xd0] sm:$0xff]   ;;  %s222_s29 = scalar_lea.vmem %s956_s3, %s685_s26 }
  0x13   : > { %v797_v2 = vld [vmem:[%s899_s19] sm:$0xff]   ;;  %749 = vmatprep.subr.bf16.mxu1 %v796_v1  ;;  %v801_v6 = vld [vmem:[%s899_s19 + $0x8] sm:$0xff]   ;;  %v805_v10 = vld [vmem:[%s899_s19 + $0x10] sm:$0xff]  }
  0x14   : > { %v798_v3 = vld [vmem:[%s899_s19 + $0x80] sm:$0xff]   ;;  %728 = vmatpush3.bf16.msra.mxu0 %v797_v2  ;;  %v802_v7 = vld [vmem:[%s899_s19 + $0x88] sm:$0xff]   ;;  %v806_v11 = vld [vmem:[%s899_s19 + $0x90] sm:$0xff]  }
  0x15   : > { %750 = vmatpush3.bf16.msra.mxu1 %v798_v3  ;;  %729 = vmatprep.subr.bf16.mxu0 %v799_v4  ;;  %v807_v12 = vld [vmem:[%s899_s19 + $0x58] sm:$0xff]   ;;  %v811_v16 = vld [vmem:[%s899_s19 + $0x60] sm:$0xff]   ;;  %v815_v20 = vld [vmem:[%s899_s19 + $0x68] sm:$0xff]  }
  0x16   : > { %751 = vmatprep.subr.bf16.mxu1 %v800_v5  ;;  %v808_v13 = vld [vmem:[%s899_s19 + $0xd8] sm:$0xff]   ;;  %v812_v17 = vld [vmem:[%s899_s19 + $0xe0] sm:$0xff]   ;;  %v816_v21 = vld [vmem:[%s899_s19 + $0xe8] sm:$0xff]  }
  0x17   : > { %v809_v14 = vld [vmem:[%s899_s19 + $0x18] sm:$0xff]   ;;  %v813_v18 = vld [vmem:[%s899_s19 + $0x20] sm:$0xff]   ;;  %v817_v22 = vld [vmem:[%s899_s19 + $0x28] sm:$0xff]  }
  0x18   : > { %730 = vmatpush3.bf16.msra.mxu0 %v801_v6  ;;  %v810_v15 = vld [vmem:[%s899_s19 + $0x98] sm:$0xff]   ;;  %v814_v19 = vld [vmem:[%s899_s19 + $0xa0] sm:$0xff]   ;;  %v818_v23 = vld [vmem:[%s899_s19 + $0xa8] sm:$0xff]  }
  0x19   : > { %752 = vmatpush3.bf16.msra.mxu1 %v802_v7  ;;  %731 = vmatprep.subr.bf16.mxu0 %v803_v8  ;;  %v819_v24 = vld [vmem:[%s899_s19 + $0x70] sm:$0xff]   ;;  %v823_v28 = vld [vmem:[%s899_s19 + $0x78] sm:$0xff]   ;;  %v224_v32 = vld [vmem:[%s210_s23] sm:$0xff] }
  0x1a   : > { %753 = vmatprep.subr.bf16.mxu1 %v804_v9  ;;  %v820_v25 = vld [vmem:[%s899_s19 + $0xf0] sm:$0xff]   ;;  %v824_v29 = vld [vmem:[%s899_s19 + $0xf8] sm:$0xff]   ;;  %v225_v33 = vld [vmem:[%s210_s23 + $0x8] sm:$0xff]  ;;  %v687_v34 = vcombine.low %v224_v32, %v224_v32  ;;  %v688_v35 = vcombine.high %v224_v32, %v224_v32 }
  0x1b   : > { %v821_v26 = vld [vmem:[%s899_s19 + $0x30] sm:$0xff]   ;;  %v825_v30 = vld [vmem:[%s899_s19 + $0x38] sm:$0xff]   ;;  %v689_v36 = vcombine.low %v225_v33, %v225_v33  ;;  %v690_v37 = vcombine.high %v225_v33, %v225_v33 }
  0x1c   : > { %732 = vmatpush3.bf16.msra.mxu0 %v805_v10  ;;  %v822_v27 = vld [vmem:[%s899_s19 + $0xb0] sm:$0xff]   ;;  %v826_v31 = vld [vmem:[%s899_s19 + $0xb8] sm:$0xff]   ;;  %535 = vmatprep.mubr.bf16.mxu0 %v688_v35 }
  0x1d   : > { %754 = vmatpush3.bf16.msra.mxu1 %v806_v11  ;;  %733 = vmatprep.subr.bf16.mxu0 %v807_v12 }
  0x1e   : > { %755 = vmatprep.subr.bf16.mxu1 %v808_v13  ;;  %575 = vmatprep.mubr.bf16.mxu1 %v690_v37 }
  0x20   : > { %734 = vmatpush3.bf16.msra.mxu0 %v809_v14 }
  0x21   : > { %756 = vmatpush3.bf16.msra.mxu1 %v810_v15  ;;  %735 = vmatprep.subr.bf16.mxu0 %v811_v16 }
  0x22   : > { %757 = vmatprep.subr.bf16.mxu1 %v812_v17 }
  0x24   : > { %736 = vmatpush3.bf16.msra.mxu0 %v813_v18 }
  0x25   : > { %758 = vmatpush3.bf16.msra.mxu1 %v814_v19  ;;  %737 = vmatprep.subr.bf16.mxu0 %v815_v20 }
  0x26   : > { %759 = vmatprep.subr.bf16.mxu1 %v816_v21 }
  0x28   : > { %738 = vmatpush3.bf16.msra.mxu0 %v817_v22 }
  0x29   : > { %760 = vmatpush3.bf16.msra.mxu1 %v818_v23  ;;  %739 = vmatprep.subr.bf16.mxu0 %v819_v24 }
  0x2a   : > { %761 = vmatprep.subr.bf16.mxu1 %v820_v25 }
  0x2c   : > { %740 = vmatpush3.bf16.msra.mxu0 %v821_v26 }
  0x2d   : > { %762 = vmatpush3.bf16.msra.mxu1 %v822_v27  ;;  %741 = vmatprep.subr.bf16.mxu0 %v823_v28 }
  0x2e   : > { %763 = vmatprep.subr.bf16.mxu1 %v824_v29 }
  0x30   : > { %742 = vmatpush3.bf16.msra.mxu0 %v825_v30 }
  0x31   : > { %764 = vmatpush3.bf16.msra.mxu1 %v826_v31 }
  0x33   : > { %536 = vmatmul.mubr.bf16.vlgmr.msra.gmra.mrb[0].mxu0 %v687_v34 }
  0x34   : > { %576 = vmatmul.mubr.bf16.vlgmr.msra.gmra.mrb[0].mxu1 %v689_v36 }
 0x106   : > { %v743_v38 = vpop.f32.mrb[0].mxu0 }
 0x107   : > { %v765_v39 = vpop.f32.mrb[0].mxu1  ;;  %v744_v41 = vpop.f32.mrb[1].mxu0 }
 0x108   : > { %v766_v42 = vpop.f32.mrb[1].mxu1  ;;  %v745_v43 = vadd.f32 %v744_v41, %v743_v38  ;;  %v746_v45 = vpop.f32.mrb[2].mxu0 }
 0x109   : > { %v767_v44 = vadd.f32 %v766_v42, %v765_v39  ;;  %v768_v46 = vpop.f32.mrb[2].mxu1  ;;  %v747_v47 = vpop.f32.mrb[3].mxu0 }
 0x10a   : > { %v769_v48 = vpop.f32.mrb[3].mxu1  ;;  %v538_v49 = vadd.f32 %v745_v43, %v686_v40 }
 0x10c   : > { %v578_v50 = vadd.f32 %v767_v44, %v538_v49 }
 0x10e   : > { %583 = vst [vmem:[%s222_s29] sm:$0xff] %v578_v50 }
 0x10f PF: > { %s13_s14 = sadd.s32 1, %s853_s14   ;;  %s957_s12 = smov %s849_s13 }
 0x110   : > { %p10_p5 = scmp.ge.s32.totalorder %s13_s14, 6   ;;  %s958_s13 = smov %s960_s15 }
 0x112   :  { %12 = sbr.rel (!%p10_p5) target bundleno = 2 (0x2), region = 65 }

// kernel: _lambda_.15
= control target key start
LH: loop header
LB: loop body
LE: loop exit
PB: predicated region body
PF: predicated region fallthrough
CT: control target
= control target key end

     0   :  { %s706_s12 = smov 0   ;;  %s708_s13 = smov 0   ;;  %s790_s0 = inlined_call_operand.vmem [shape: bf16[4,32,256], index: 0, kind: input, shape index: {}]   ;;  %s791_s1 = inlined_call_operand.vmem [shape: bf16[4,256,128], index: 1, kind: input, shape index: {}]   ;;  %s792_s2 = inlined_call_operand.vmem [shape: f32[1,128], index: 2, kind: input, shape index: {}]   ;;  %s793_s3 = inlined_call_operand.vmem [shape: f32[4,32,128], index: 3, kind: output, shape index: {}]  }
   0x1   :  { %s710_s14 = smov 0   ;;  %s712_s15 = smov 0  }
   0x2   :  { %s714_s16 = smov 0  }
   0x3 LB: > { %s22_s17 = sadd.s32 1, %s676_s14  ;;  %s25_s18 = sadd.s32 1, %s680_s15  ;;  %s684_s16 = sphi %s714_s16, %s13_s16   ;;  %s680_s15 = sphi %s712_s15, %s797_s15   ;;  %s676_s14 = sphi %s710_s14, %s796_s14   ;;  %s672_s13 = sphi %s708_s13, %s795_s13   ;;  %s668_s12 = sphi %s706_s12, %s794_s12  }
   0x4   : > { %p23_p0 = scmp.ge.s32.totalorder %s22_s17, 2  ;;  %p533_p1 = scmp.ge.s32.totalorder %s684_s16, 1 }
   0x5   : > { %p169_p2 = scmp.lt.s32.totalorder %s684_s16, 9 }
   0x6   : > { %s799_s17 = smov (%p23_p0, %s22_s17), 0  ;;  %s801_s18 = smov (!%p23_p0, %s25_s18), %s680_s15 }
   0x7   : > { %p170_p3 = pnand %p533_p1, %p169_p2  ;;  %p27_p4 = scmp.ge.s32.totalorder %s801_s18, 4 }
   0x8   : > { %p208_p5 = scmp.lt.s32.totalorder (!%p170_p3), %s672_s13, 3  ;;  %s534_s19 = sshll.u32 (!%p170_p3), %s668_s12, 1  ;;  %v543_v19 = vld [vmem:[%s792_s2] ss:$0 sm:$0xff] (!%p170_p3) }
   0x9   : > { %s803_s18 = smov (%p27_p4, %s801_s18), 0  ;;  %173 = sbr.rel (%p170_p3) target bundleno = 272 (0x110), region = 32 }
   0xa   : > { %p210_p6 = scmp.lt.s32.totalorder (!%p170_p3), %s534_s19, 3 }
  0x10   : > { %s805_s13 = smov (!%p208_p5, %s672_s13), 3  ;;  %s807_s19 = smov (!%p210_p6, %s534_s19), 3 }
  0x11   : > { %s564_s20 = sshll.u32 %s805_s13, 7  ;;  %s535_s24 = sshll.u32 %s807_s19, 1 }
  0x12   : > { %s742_s23 = scalar_lea.vmem %s791_s1, %s564_s20  ;;  %s536_s25 = sshll.u32 %s805_s13, 3 }
  0x13   : > { %v627_v0 = vld [vmem:[%s742_s23 + $0x40] sm:$0xff]   ;;  %v629_v2 = vld [vmem:[%s742_s23 + $0x48] sm:$0xff]   ;;  %v631_v4 = vld [vmem:[%s742_s23 + $0x50] sm:$0xff]   ;;  %s214_s26 = sadd.s32 %s536_s25, %s535_s24  ;;  %s541_s4 = sshll.u32 %s805_s13, 2 }
  0x14   : > { %v628_v1 = vld [vmem:[%s742_s23] sm:$0xff]   ;;  %565 = vmatprep.subr.bf16.mxu0 %v627_v0  ;;  %v630_v3 = vld [vmem:[%s742_s23 + $0x8] sm:$0xff]   ;;  %v632_v5 = vld [vmem:[%s742_s23 + $0x10] sm:$0xff]   ;;  %s537_s27 = sshll.u32 %s214_s26, 2  ;;  %s229_s5 = sadd.s32 %s541_s4, %s807_s19 }
  0x15   : > { %566 = vmatpush3.bf16.msra.mxu0 %v628_v1  ;;  %v633_v6 = vld [vmem:[%s742_s23 + $0x58] sm:$0xff]   ;;  %v635_v8 = vld [vmem:[%s742_s23 + $0x60] sm:$0xff]   ;;  %s216_s30 = scalar_lea.vmem %s790_s0, %s537_s27  ;;  %v637_v10 = vld [vmem:[%s742_s23 + $0x68] sm:$0xff]   ;;  %s542_s6 = sshll.u32 %s229_s5, 3 }
  0x16   : > { %567 = vmatprep.subr.bf16.mxu0 %v629_v2  ;;  %v634_v7 = vld [vmem:[%s742_s23 + $0x18] sm:$0xff]   ;;  %v636_v9 = vld [vmem:[%s742_s23 + $0x20] sm:$0xff]   ;;  %v638_v12 = vld [vmem:[%s742_s23 + $0x28] sm:$0xff]   ;;  %s231_s11 = scalar_lea.vmem %s793_s3, %s542_s6 }
  0x17   : > { %v645_v11 = vld [vmem:[%s216_s30 + $0x4] ss:$8 sps:$4 sm:$0xff]   ;;  %v639_v13 = vld [vmem:[%s742_s23 + $0x70] sm:$0xff]   ;;  %v641_v15 = vld [vmem:[%s742_s23 + $0x78] sm:$0xff]  }
  0x18   : > { %413 = vmatprep.mubr.bf16.mxu0 %v645_v11  ;;  %v640_v14 = vld [vmem:[%s742_s23 + $0x30] sm:$0xff]   ;;  %v642_v16 = vld [vmem:[%s742_s23 + $0x38] sm:$0xff]   ;;  %v643_v17 = vld [vmem:[%s216_s30] ss:$8 sps:$4 sm:$0xff]  }
  0x19   : > { %568 = vmatpush3.bf16.msra.mxu0 %v630_v3 }
  0x1a   : > { %569 = vmatprep.subr.bf16.mxu0 %v631_v4 }
  0x1d   : > { %570 = vmatpush3.bf16.msra.mxu0 %v632_v5 }
  0x1e   : > { %571 = vmatprep.subr.bf16.mxu0 %v633_v6 }
  0x21   : > { %572 = vmatpush3.bf16.msra.mxu0 %v634_v7 }
  0x22   : > { %573 = vmatprep.subr.bf16.mxu0 %v635_v8 }
  0x25   : > { %574 = vmatpush3.bf16.msra.mxu0 %v636_v9 }
  0x26   : > { %575 = vmatprep.subr.bf16.mxu0 %v637_v10 }
  0x29   : > { %576 = vmatpush3.bf16.msra.mxu0 %v638_v12 }
  0x2a   : > { %577 = vmatprep.subr.bf16.mxu0 %v639_v13 }
  0x2d   : > { %578 = vmatpush3.bf16.msra.mxu0 %v640_v14 }
  0x2e   : > { %579 = vmatprep.subr.bf16.mxu0 %v641_v15 }
  0x31   : > { %580 = vmatpush3.bf16.msra.mxu0 %v642_v16 }
  0x34   : > { %414 = vmatmul.mubr.bf16.vlgmr.msra.gmra.mrb[0].mxu0 %v643_v17 }
 0x107   : > { %v581_v18 = vpop.f32.mrb[0].mxu0 }
 0x108   : > { %v582_v20 = vpop.f32.mrb[1].mxu0 }
 0x109   : > { %v583_v21 = vadd.f32 %v582_v20, %v581_v18  ;;  %v584_v22 = vpop.f32.mrb[2].mxu0 }
 0x10a   : > { %v585_v23 = vpop.f32.mrb[3].mxu0 }
 0x10b   : > { %v416_v24 = vadd.f32 %v583_v21, %v543_v19  ;;  %v586_v25 = vadd.f32 %v585_v23, %v584_v22 }
 0x10d   : > { %422 = vst [vmem:[%s231_s11] sm:$0xff] %v416_v24  ;;  %v419_v26 = vadd.f32 %v586_v25, %v543_v19 }
 0x10f   : > { %423 = vst [vmem:[%s231_s11 + $0x8] sm:$0xff] %v419_v26 }
 0x110 PF: > { %s13_s16 = sadd.s32 1, %s684_s16   ;;  %s794_s12 = smov %s676_s14 }
 0x111   : > { %p10_p7 = scmp.ge.s32.totalorder %s13_s16, 10   ;;  %s795_s13 = smov %s680_s15 }
 0x112   : > { %s796_s14 = smov %s799_s17  ;;  %s797_s15 = smov %s803_s18 }
 0x113   :  { %12 = sbr.rel (!%p10_p7) target bundleno = 3 (0x3), region = 65 }

// kernel: _lambda_.16
= control target key start
LH: loop header
LB: loop body
LE: loop exit
PB: predicated region body
PF: predicated region fallthrough
CT: control target
= control target key end

     0   :  { %s702_s12 = smov 0   ;;  %s704_s13 = smov 0   ;;  %s779_s0 = inlined_call_operand.vmem [shape: bf16[4,128,128], index: 0, kind: input, shape index: {}]   ;;  %s780_s1 = inlined_call_operand.vmem [shape: bf16[4,128,128], index: 1, kind: input, shape index: {}]   ;;  %s781_s2 = inlined_call_operand.vmem [shape: f32[1,128], index: 2, kind: input, shape index: {}]   ;;  %s782_s3 = inlined_call_operand.vmem [shape: f32[4,128,128], index: 3, kind: output, shape index: {}]  }
   0x1   :  { %s706_s14 = smov 0   ;;  %s708_s15 = smov 0  }
   0x2   :  { %s710_s16 = smov 0  }
   0x3 LB: > { %s22_s17 = sadd.s32 1, %s672_s14  ;;  %s25_s18 = sadd.s32 1, %s676_s15  ;;  %s680_s16 = sphi %s710_s16, %s13_s16   ;;  %s676_s15 = sphi %s708_s15, %s786_s15   ;;  %s672_s14 = sphi %s706_s14, %s785_s14   ;;  %s668_s13 = sphi %s704_s13, %s784_s13   ;;  %s664_s12 = sphi %s702_s12, %s783_s12  }
   0x4   : > { %p23_p0 = scmp.ge.s32.totalorder %s22_s17, 2  ;;  %p513_p1 = scmp.ge.s32.totalorder %s680_s16, 1 }
   0x5   : > { %p168_p2 = scmp.lt.s32.totalorder %s680_s16, 9 }
   0x6   : > { %s788_s17 = smov (%p23_p0, %s22_s17), 0  ;;  %s790_s18 = smov (!%p23_p0, %s25_s18), %s676_s15 }
   0x7   : > { %p169_p3 = pnand %p513_p1, %p168_p2  ;;  %p27_p4 = scmp.ge.s32.totalorder %s790_s18, 4 }
   0x8   : > { %p206_p5 = scmp.lt.s32.totalorder (!%p169_p3), %s668_s13, 3  ;;  %s514_s19 = sshll.u32 (!%p169_p3), %s664_s12, 3  ;;  %v522_v12 = vld [vmem:[%s781_s2] ss:$0 sm:$0xff] (!%p169_p3) }
   0x9   : > { %s792_s18 = smov (%p27_p4, %s790_s18), 0  ;;  %172 = sbr.rel (%p169_p3) target bundleno = 270 (0x10e), region = 32 }
   0xa   : > { %p208_p6 = scmp.lt.s32.totalorder (!%p169_p3), %s514_s19, 15 }
  0x10   : > { %s794_s13 = smov (!%p206_p5, %s668_s13), 3  ;;  %s796_s19 = smov (!%p208_p6, %s514_s19), 15 }
  0x11   : > { %s537_s20 = sshll.u32 %s794_s13, 6  ;;  %s515_s21 = sshll.u32 %s794_s13, 4 }
  0x12   : > { %s735_s24 = scalar_lea.vmem %s780_s1, %s537_s20  ;;  %s737_s25 = sadd.s32 %s515_s21, %s796_s19 }
  0x13   : > { %v630_v0 = vld [vmem:[%s735_s24] sm:$0xff]   ;;  %v631_v1 = vld [vmem:[%s735_s24 + $0x8] sm:$0xff]   ;;  %s516_s26 = sshll.u32 %s737_s25, 2  ;;  %v632_v2 = vld [vmem:[%s735_s24 + $0x10] sm:$0xff]   ;;  %s521_s30 = sshll.u32 %s737_s25, 3 }
  0x14   : > { %550 = vmatprep.subr.bf16.mxu0 %v630_v0  ;;  %574 = vmatprep.subr.bf16.mxu1 %v630_v0  ;;  %s746_s29 = scalar_lea.vmem %s779_s0, %s516_s26  ;;  %v633_v3 = vld [vmem:[%s735_s24 + $0x18] sm:$0xff]   ;;  %v634_v6 = vld [vmem:[%s735_s24 + $0x20] sm:$0xff]   ;;  %v635_v7 = vld [vmem:[%s735_s24 + $0x28] sm:$0xff]   ;;  %s228_s8 = scalar_lea.vmem %s782_s3, %s521_s30 }
  0x15   : > { %551 = vmatpush3.bf16.msra.mxu0 %v630_v0  ;;  %582 = vmatpush3.bf16.msra.mxu1 %v630_v0  ;;  %v638_v4 = vld [vmem:[%s746_s29] sm:$0xff]   ;;  %v639_v5 = vld [vmem:[%s746_s29 + $0x10] sm:$0xff]   ;;  %v637_v9 = vld [vmem:[%s735_s24 + $0x38] sm:$0xff]  }
  0x16   : > { %552 = vmatprep.subr.bf16.mxu0 %v631_v1  ;;  %575 = vmatprep.subr.bf16.mxu1 %v631_v1  ;;  %v636_v8 = vld [vmem:[%s735_s24 + $0x30] sm:$0xff]   ;;  %v640_v10 = vld [vmem:[%s746_s29 + $0x8] sm:$0xff]   ;;  %v641_v11 = vld [vmem:[%s746_s29 + $0x18] sm:$0xff]  }
  0x17   : > { %566 = vmatprep.mubr.bf16.mxu0 %v638_v4  ;;  %570 = vmatprep.mubr.bf16.mxu1 %v639_v5 }
  0x19   : > { %553 = vmatpush3.bf16.msra.mxu0 %v631_v1  ;;  %583 = vmatpush3.bf16.msra.mxu1 %v631_v1 }
  0x1a   : > { %554 = vmatprep.subr.bf16.mxu0 %v632_v2  ;;  %576 = vmatprep.subr.bf16.mxu1 %v632_v2 }
  0x1d   : > { %555 = vmatpush3.bf16.msra.mxu0 %v632_v2  ;;  %584 = vmatpush3.bf16.msra.mxu1 %v632_v2 }
  0x1e   : > { %556 = vmatprep.subr.bf16.mxu0 %v633_v3  ;;  %577 = vmatprep.subr.bf16.mxu1 %v633_v3 }
  0x21   : > { %557 = vmatpush3.bf16.msra.mxu0 %v633_v3  ;;  %585 = vmatpush3.bf16.msra.mxu1 %v633_v3 }
  0x22   : > { %558 = vmatprep.subr.bf16.mxu0 %v634_v6  ;;  %578 = vmatprep.subr.bf16.mxu1 %v634_v6 }
  0x25   : > { %559 = vmatpush3.bf16.msra.mxu0 %v634_v6  ;;  %586 = vmatpush3.bf16.msra.mxu1 %v634_v6 }
  0x26   : > { %560 = vmatprep.subr.bf16.mxu0 %v635_v7  ;;  %579 = vmatprep.subr.bf16.mxu1 %v635_v7 }
  0x29   : > { %561 = vmatpush3.bf16.msra.mxu0 %v635_v7  ;;  %587 = vmatpush3.bf16.msra.mxu1 %v635_v7 }
  0x2a   : > { %562 = vmatprep.subr.bf16.mxu0 %v636_v8  ;;  %580 = vmatprep.subr.bf16.mxu1 %v636_v8 }
  0x2d   : > { %563 = vmatpush3.bf16.msra.mxu0 %v636_v8  ;;  %588 = vmatpush3.bf16.msra.mxu1 %v636_v8 }
  0x2e   : > { %564 = vmatprep.subr.bf16.mxu0 %v637_v9  ;;  %581 = vmatprep.subr.bf16.mxu1 %v637_v9 }
  0x31   : > { %565 = vmatpush3.bf16.msra.mxu0 %v637_v9  ;;  %589 = vmatpush3.bf16.msra.mxu1 %v637_v9 }
  0x34   : > { %567 = vmatmul.mubr.bf16.vlgmr.msra.gmra.mrb[0].mxu0 %v640_v10  ;;  %571 = vmatmul.mubr.bf16.vlgmr.msra.gmra.mrb[0].mxu1 %v641_v11 }
 0x107   : > { %v568_v13 = vpop.f32.mrb[0].mxu0  ;;  %v572_v14 = vpop.f32.mrb[0].mxu1 }
 0x108   : > { %v377_v15 = vadd.f32 %v568_v13, %v522_v12  ;;  %v393_v16 = vadd.f32 %v572_v14, %v522_v12  ;;  %v368_v17 = vpop.f32.mrb[1].mxu0  ;;  %v384_v18 = vpop.f32.mrb[1].mxu1 }
 0x109   : > { %v369_v19 = vadd.f32 %v522_v12, %v368_v17  ;;  %v385_v20 = vadd.f32 %v522_v12, %v384_v18  ;;  %v569_v21 = vpop.f32.mrb[2].mxu0  ;;  %v573_v22 = vpop.f32.mrb[2].mxu1 }
 0x10a   : > { %401 = vst [vmem:[%s228_s8 + $0x10] sm:$0xff] %v377_v15  ;;  %405 = vst [vmem:[%s228_s8 + $0x30] sm:$0xff] %v393_v16  ;;  %v380_v23 = vadd.f32 %v569_v21, %v522_v12  ;;  %v396_v24 = vadd.f32 %v573_v22, %v522_v12  ;;  %v371_v25 = vpop.f32.mrb[3].mxu0  ;;  %v387_v26 = vpop.f32.mrb[3].mxu1 }
 0x10b   : > { %399 = vst [vmem:[%s228_s8] sm:$0xff] %v369_v19  ;;  %403 = vst [vmem:[%s228_s8 + $0x20] sm:$0xff] %v385_v20  ;;  %v372_v27 = vadd.f32 %v522_v12, %v371_v25  ;;  %v388_v28 = vadd.f32 %v522_v12, %v387_v26 }
 0x10c   : > { %402 = vst [vmem:[%s228_s8 + $0x18] sm:$0xff] %v380_v23  ;;  %406 = vst [vmem:[%s228_s8 + $0x38] sm:$0xff] %v396_v24 }
 0x10d   : > { %400 = vst [vmem:[%s228_s8 + $0x8] sm:$0xff] %v372_v27  ;;  %404 = vst [vmem:[%s228_s8 + $0x28] sm:$0xff] %v388_v28 }
 0x10e PF: > { %s13_s16 = sadd.s32 1, %s680_s16   ;;  %s783_s12 = smov %s672_s14 }
 0x10f   : > { %p10_p7 = scmp.ge.s32.totalorder %s13_s16, 10   ;;  %s784_s13 = smov %s676_s15 }
 0x110   : > { %s785_s14 = smov %s788_s17  ;;  %s786_s15 = smov %s792_s18 }
 0x111   :  { %12 = sbr.rel (!%p10_p7) target bundleno = 3 (0x3), region = 65 }

// kernel: _lambda_.17
= control target key start
LH: loop header
LB: loop body
LE: loop exit
PB: predicated region body
PF: predicated region fallthrough
CT: control target
= control target key end

     0   :  { %s1074_s12 = smov 0   ;;  %s1076_s13 = smov 0   ;;  %s1231_s0 = inlined_call_operand.vmem [shape: bf16[4,512,128], index: 0, kind: input, shape index: {}]   ;;  %s1232_s1 = inlined_call_operand.vmem [shape: bf16[4,128,128], index: 1, kind: input, shape index: {}]   ;;  %s1233_s2 = inlined_call_operand.vmem [shape: f32[1,128], index: 2, kind: input, shape index: {}]   ;;  %s1234_s3 = inlined_call_operand.vmem [shape: f32[4,512,128], index: 3, kind: output, shape index: {}]  }
   0x1   :  { %s1078_s14 = smov 0   ;;  %s1080_s15 = smov 0  }
   0x2   :  { %s1082_s16 = smov 0  }
   0x3 LB: > { %s22_s17 = sadd.s32 1, %s1044_s14  ;;  %s25_s18 = sadd.s32 1, %s1048_s15  ;;  %s1052_s16 = sphi %s1082_s16, %s13_s16   ;;  %s1048_s15 = sphi %s1080_s15, %s1238_s15   ;;  %s1044_s14 = sphi %s1078_s14, %s1237_s14   ;;  %s1040_s13 = sphi %s1076_s13, %s1236_s13   ;;  %s1036_s12 = sphi %s1074_s12, %s1235_s12  }
   0x4   : > { %p23_p0 = scmp.ge.s32.totalorder %s22_s17, 2  ;;  %p761_p1 = scmp.ge.s32.totalorder %s1052_s16, 1 }
   0x5   : > { %p168_p2 = scmp.lt.s32.totalorder %s1052_s16, 9 }
   0x6   : > { %s1240_s17 = smov (%p23_p0, %s22_s17), 0  ;;  %s1242_s18 = smov (!%p23_p0, %s25_s18), %s1048_s15 }
   0x7   : > { %p169_p3 = pnand %p761_p1, %p168_p2  ;;  %p27_p4 = scmp.ge.s32.totalorder %s1242_s18, 4 }
   0x8   : > { %s762_s19 = sshll.u32 (!%p169_p3), %s1036_s12, 5  ;;  %p206_p5 = scmp.lt.s32.totalorder (!%p169_p3), %s1040_s13, 3  ;;  %v1144_v24 = vld [vmem:[%s1233_s2] ss:$0 sm:$0xff] (!%p169_p3) }
   0x9   : > { %s1244_s18 = smov (%p27_p4, %s1242_s18), 0  ;;  %172 = sbr.rel (%p169_p3) target bundleno = 312 (0x138), region = 32 }
   0xa   : > { %p208_p6 = scmp.lt.s32.totalorder (!%p169_p3), %s762_s19, 63 }
  0x10   : > { %s1246_s13 = smov (!%p206_p5, %s1040_s13), 3  ;;  %s1248_s19 = smov (!%p208_p6, %s762_s19), 63 }
  0x11   : > { %s763_s20 = sshll.u32 %s1246_s13, 6 }
  0x12   : > { %s1107_s23 = scalar_lea.vmem %s1232_s1, %s763_s20  ;;  %s1109_s24 = sadd.s32 %s763_s20, %s1248_s19 }
  0x13   : > { %v926_v0 = vld [vmem:[%s1107_s23] sm:$0xff]   ;;  %v927_v1 = vld [vmem:[%s1107_s23 + $0x8] sm:$0xff]   ;;  %s764_s25 = sshll.u32 %s1109_s24, 2  ;;  %v928_v2 = vld [vmem:[%s1107_s23 + $0x10] sm:$0xff]   ;;  %s769_s4 = sshll.u32 %s1109_s24, 3 }
  0x14   : > { %822 = vmatprep.subr.bf16.mxu0 %v926_v0  ;;  %870 = vmatprep.subr.bf16.mxu1 %v926_v0  ;;  %s1118_s28 = scalar_lea.vmem %s1231_s0, %s764_s25  ;;  %v929_v3 = vld [vmem:[%s1107_s23 + $0x18] sm:$0xff]   ;;  %v930_v6 = vld [vmem:[%s1107_s23 + $0x20] sm:$0xff]   ;;  %v931_v7 = vld [vmem:[%s1107_s23 + $0x28] sm:$0xff]   ;;  %s1162_s7 = scalar_lea.vmem %s1234_s3, %s769_s4 }
  0x15   : > { %823 = vmatpush3.bf16.msra.mxu0 %v926_v0  ;;  %878 = vmatpush3.bf16.msra.mxu1 %v926_v0  ;;  %v934_v4 = vld [vmem:[%s1118_s28] sm:$0xff]   ;;  %v932_v8 = vld [vmem:[%s1107_s23 + $0x30] sm:$0xff]   ;;  %v933_v9 = vld [vmem:[%s1107_s23 + $0x38] sm:$0xff]  }
  0x16   : > { %824 = vmatprep.subr.bf16.mxu0 %v927_v1  ;;  %871 = vmatprep.subr.bf16.mxu1 %v927_v1  ;;  %v935_v5 = vld [vmem:[%s1118_s28 + $0x40] sm:$0xff]   ;;  %v936_v10 = vld [vmem:[%s1118_s28 + $0x8] sm:$0xff]   ;;  %v938_v12 = vld [vmem:[%s1118_s28 + $0x10] sm:$0xff]  }
  0x17   : > { %838 = vmatprep.mubr.bf16.mxu0 %v934_v4  ;;  %854 = vmatprep.mubr.bf16.mxu1 %v935_v5  ;;  %v937_v11 = vld [vmem:[%s1118_s28 + $0x48] sm:$0xff]   ;;  %v939_v13 = vld [vmem:[%s1118_s28 + $0x50] sm:$0xff]   ;;  %v940_v14 = vld [vmem:[%s1118_s28 + $0x18] sm:$0xff]  }
  0x18   : > { %v941_v15 = vld [vmem:[%s1118_s28 + $0x58] sm:$0xff]   ;;  %v942_v16 = vld [vmem:[%s1118_s28 + $0x20] sm:$0xff]   ;;  %v944_v18 = vld [vmem:[%s1118_s28 + $0x28] sm:$0xff]  }
  0x19   : > { %825 = vmatpush3.bf16.msra.mxu0 %v927_v1  ;;  %879 = vmatpush3.bf16.msra.mxu1 %v927_v1  ;;  %v943_v17 = vld [vmem:[%s1118_s28 + $0x60] sm:$0xff]   ;;  %v945_v19 = vld [vmem:[%s1118_s28 + $0x68] sm:$0xff]   ;;  %v946_v20 = vld [vmem:[%s1118_s28 + $0x30] sm:$0xff]  }
  0x1a   : > { %826 = vmatprep.subr.bf16.mxu0 %v928_v2  ;;  %872 = vmatprep.subr.bf16.mxu1 %v928_v2  ;;  %v947_v21 = vld [vmem:[%s1118_s28 + $0x70] sm:$0xff]   ;;  %v948_v22 = vld [vmem:[%s1118_s28 + $0x38] sm:$0xff]  }
  0x1b   : > { %v949_v23 = vld [vmem:[%s1118_s28 + $0x78] sm:$0xff]  }
  0x1d   : > { %827 = vmatpush3.bf16.msra.mxu0 %v928_v2  ;;  %880 = vmatpush3.bf16.msra.mxu1 %v928_v2 }
  0x1e   : > { %828 = vmatprep.subr.bf16.mxu0 %v929_v3  ;;  %873 = vmatprep.subr.bf16.mxu1 %v929_v3 }
  0x21   : > { %829 = vmatpush3.bf16.msra.mxu0 %v929_v3  ;;  %881 = vmatpush3.bf16.msra.mxu1 %v929_v3 }
  0x22   : > { %830 = vmatprep.subr.bf16.mxu0 %v930_v6  ;;  %874 = vmatprep.subr.bf16.mxu1 %v930_v6 }
  0x25   : > { %831 = vmatpush3.bf16.msra.mxu0 %v930_v6  ;;  %882 = vmatpush3.bf16.msra.mxu1 %v930_v6 }
  0x26   : > { %832 = vmatprep.subr.bf16.mxu0 %v931_v7  ;;  %875 = vmatprep.subr.bf16.mxu1 %v931_v7 }
  0x29   : > { %833 = vmatpush3.bf16.msra.mxu0 %v931_v7  ;;  %883 = vmatpush3.bf16.msra.mxu1 %v931_v7 }
  0x2a   : > { %834 = vmatprep.subr.bf16.mxu0 %v932_v8  ;;  %876 = vmatprep.subr.bf16.mxu1 %v932_v8 }
  0x2d   : > { %835 = vmatpush3.bf16.msra.mxu0 %v932_v8  ;;  %884 = vmatpush3.bf16.msra.mxu1 %v932_v8 }
  0x2e   : > { %836 = vmatprep.subr.bf16.mxu0 %v933_v9  ;;  %877 = vmatprep.subr.bf16.mxu1 %v933_v9 }
  0x31   : > { %837 = vmatpush3.bf16.msra.mxu0 %v933_v9  ;;  %885 = vmatpush3.bf16.msra.mxu1 %v933_v9 }
  0x34   : > { %839 = vmatmul.mubr.bf16.vlgmr.msra.gmra.mrb[0].mxu0 %v936_v10  ;;  %855 = vmatmul.mubr.bf16.vlgmr.msra.gmra.mrb[0].mxu1 %v937_v11 }
  0x35   : > { %842 = vmatprep.mubr.bf16.mxu0 %v938_v12  ;;  %858 = vmatprep.mubr.bf16.mxu1 %v939_v13 }
  0x3c   : > { %843 = vmatmul.mubr.bf16.gmra.mrb[4].mxu0 %v940_v14  ;;  %859 = vmatmul.mubr.bf16.gmra.mrb[4].mxu1 %v941_v15 }
  0x3d   : > { %846 = vmatprep.mubr.bf16.mxu0 %v942_v16  ;;  %862 = vmatprep.mubr.bf16.mxu1 %v943_v17 }
  0x44   : > { %847 = vmatmul.mubr.bf16.gmra.mrb[8].mxu0 %v944_v18  ;;  %863 = vmatmul.mubr.bf16.gmra.mrb[8].mxu1 %v945_v19 }
  0x45   : > { %850 = vmatprep.mubr.bf16.mxu0 %v946_v20  ;;  %866 = vmatprep.mubr.bf16.mxu1 %v947_v21 }
  0x4c   : > { %851 = vmatmul.mubr.bf16.gmra.mrb[12].mxu0 %v948_v22  ;;  %867 = vmatmul.mubr.bf16.gmra.mrb[12].mxu1 %v949_v23 }
 0x107   : > { %v840_v25 = vpop.f32.mrb[0].mxu0  ;;  %v856_v26 = vpop.f32.mrb[0].mxu1 }
 0x108   : > { %v473_v27 = vadd.f32 %v840_v25, %v1144_v24  ;;  %v537_v28 = vadd.f32 %v856_v26, %v1144_v24  ;;  %v464_v29 = vpop.f32.mrb[1].mxu0  ;;  %v528_v30 = vpop.f32.mrb[1].mxu1 }
 0x109   : > { %v465_v31 = vadd.f32 %v1144_v24, %v464_v29  ;;  %v529_v32 = vadd.f32 %v1144_v24, %v528_v30  ;;  %v841_v33 = vpop.f32.mrb[2].mxu0  ;;  %v857_v34 = vpop.f32.mrb[2].mxu1 }
 0x10a   : > { %950 = vtanh.f32 %v473_v27  ;;  %v476_v35 = vadd.f32 %v841_v33, %v1144_v24  ;;  %v467_v36 = vpop.f32.mrb[3].mxu0  ;;  %v531_v37 = vpop.f32.mrb[3].mxu1  ;;  %v540_v38 = vadd.f32 %v857_v34, %v1144_v24 }
 0x10b   : > { %952 = vtanh.f32 %v537_v28  ;;  %v468_v39 = vadd.f32 %v1144_v24, %v467_v36  ;;  %v532_v40 = vadd.f32 %v1144_v24, %v531_v37 }
 0x10c   : > { %954 = vtanh.f32 %v465_v31 }
 0x10d   : > { %956 = vtanh.f32 %v529_v32 }
 0x10e   : > { %958 = vtanh.f32 %v476_v35 }
 0x10f   : > { %960 = vtanh.f32 %v540_v38  ;;  %v844_v41 = vpop.f32.mrb[4].mxu0  ;;  %v860_v42 = vpop.f32.mrb[4].mxu1 }
 0x110   : > { %962 = vtanh.f32 %v468_v39  ;;  %v489_v43 = vadd.f32 %v844_v41, %v1144_v24  ;;  %v553_v44 = vadd.f32 %v860_v42, %v1144_v24  ;;  %v480_v45 = vpop.f32.mrb[5].mxu0  ;;  %v544_v46 = vpop.f32.mrb[5].mxu1 }
 0x111   : > { %964 = vtanh.f32 %v532_v40  ;;  %v481_v47 = vadd.f32 %v1144_v24, %v480_v45  ;;  %v545_v48 = vadd.f32 %v1144_v24, %v544_v46  ;;  %v845_v49 = vpop.f32.mrb[6].mxu0  ;;  %v861_v50 = vpop.f32.mrb[6].mxu1 }
 0x112   : > { %966 = vtanh.f32 %v489_v43  ;;  %v492_v51 = vadd.f32 %v845_v49, %v1144_v24  ;;  %v483_v52 = vpop.f32.mrb[7].mxu0  ;;  %v547_v53 = vpop.f32.mrb[7].mxu1  ;;  %v556_v54 = vadd.f32 %v861_v50, %v1144_v24 }
 0x113   : > { %968 = vtanh.f32 %v553_v44  ;;  %v484_v56 = vadd.f32 %v1144_v24, %v483_v52  ;;  %v548_v58 = vadd.f32 %v1144_v24, %v547_v53 }
 0x114   : > { %v951_v55 = vpop.eup %950  ;;  %970 = vtanh.f32 %v481_v47 }
 0x115   : > { %v953_v57 = vpop.eup %952  ;;  %625 = vst [vmem:[%s1162_s7 + $0x10] sm:$0xff] %v951_v55  ;;  %972 = vtanh.f32 %v545_v48 }
 0x116   : > { %v955_v59 = vpop.eup %954  ;;  %641 = vst [vmem:[%s1162_s7 + $0x90] sm:$0xff] %v953_v57  ;;  %974 = vtanh.f32 %v492_v51 }
 0x117   : > { %v957_v60 = vpop.eup %956  ;;  %623 = vst [vmem:[%s1162_s7] sm:$0xff] %v955_v59  ;;  %976 = vtanh.f32 %v556_v54  ;;  %v848_v61 = vpop.f32.mrb[8].mxu0 }
 0x118   : > { %v864_v62 = vpop.f32.mrb[8].mxu1  ;;  %v959_v63 = vpop.eup %958  ;;  %639 = vst [vmem:[%s1162_s7 + $0x80] sm:$0xff] %v957_v60  ;;  %978 = vtanh.f32 %v484_v56  ;;  %v505_v0 = vadd.f32 %v848_v61, %v1144_v24 }
 0x119   : > { %v569_v1 = vadd.f32 %v864_v62, %v1144_v24  ;;  %v496_v2 = vpop.f32.mrb[9].mxu0  ;;  %v560_v3 = vpop.f32.mrb[9].mxu1  ;;  %626 = vst [vmem:[%s1162_s7 + $0x18] sm:$0xff] %v959_v63  ;;  %980 = vtanh.f32 %v548_v58 }
 0x11a   : > { %v961_v4 = vpop.eup %960  ;;  %v497_v5 = vadd.f32 %v1144_v24, %v496_v2  ;;  %v561_v6 = vadd.f32 %v1144_v24, %v560_v3  ;;  %v849_v7 = vpop.f32.mrb[10].mxu0  ;;  %982 = vtanh.f32 %v505_v0 }
 0x11b   : > { %v865_v8 = vpop.f32.mrb[10].mxu1  ;;  %v963_v9 = vpop.eup %962  ;;  %642 = vst [vmem:[%s1162_s7 + $0x98] sm:$0xff] %v961_v4  ;;  %v508_v10 = vadd.f32 %v849_v7, %v1144_v24  ;;  %984 = vtanh.f32 %v569_v1 }
 0x11c   : > { %v499_v11 = vpop.f32.mrb[11].mxu0  ;;  %v563_v12 = vpop.f32.mrb[11].mxu1  ;;  %624 = vst [vmem:[%s1162_s7 + $0x8] sm:$0xff] %v963_v9  ;;  %v572_v14 = vadd.f32 %v865_v8, %v1144_v24  ;;  %986 = vtanh.f32 %v497_v5 }
 0x11d   : > { %v965_v13 = vpop.eup %964  ;;  %v500_v16 = vadd.f32 %v1144_v24, %v499_v11  ;;  %988 = vtanh.f32 %v561_v6  ;;  %v564_v18 = vadd.f32 %v1144_v24, %v563_v12 }
 0x11e   : > { %v967_v15 = vpop.eup %966  ;;  %640 = vst [vmem:[%s1162_s7 + $0x88] sm:$0xff] %v965_v13  ;;  %990 = vtanh.f32 %v508_v10 }
 0x11f   : > { %v969_v17 = vpop.eup %968  ;;  %629 = vst [vmem:[%s1162_s7 + $0x30] sm:$0xff] %v967_v15  ;;  %992 = vtanh.f32 %v572_v14  ;;  %v852_v21 = vpop.f32.mrb[12].mxu0 }
 0x120   : > { %v971_v19 = vpop.eup %970  ;;  %645 = vst [vmem:[%s1162_s7 + $0xb0] sm:$0xff] %v969_v17  ;;  %v868_v22 = vpop.f32.mrb[12].mxu1  ;;  %994 = vtanh.f32 %v500_v16  ;;  %v521_v25 = vadd.f32 %v852_v21, %v1144_v24 }
 0x121   : > { %v973_v20 = vpop.eup %972  ;;  %627 = vst [vmem:[%s1162_s7 + $0x20] sm:$0xff] %v971_v19  ;;  %v585_v26 = vadd.f32 %v868_v22, %v1144_v24  ;;  %v512_v27 = vpop.f32.mrb[13].mxu0  ;;  %996 = vtanh.f32 %v564_v18 }
 0x122   : > { %v975_v23 = vpop.eup %974  ;;  %643 = vst [vmem:[%s1162_s7 + $0xa0] sm:$0xff] %v973_v20  ;;  %v576_v28 = vpop.f32.mrb[13].mxu1  ;;  %v513_v30 = vadd.f32 %v1144_v24, %v512_v27  ;;  %998 = vtanh.f32 %v521_v25 }
 0x123   : > { %v977_v29 = vpop.eup %976  ;;  %630 = vst [vmem:[%s1162_s7 + $0x38] sm:$0xff] %v975_v23  ;;  %v577_v31 = vadd.f32 %v1144_v24, %v576_v28  ;;  %v853_v32 = vpop.f32.mrb[14].mxu0  ;;  %1000 = vtanh.f32 %v585_v26 }
 0x124   : > { %v869_v33 = vpop.f32.mrb[14].mxu1  ;;  %v979_v34 = vpop.eup %978  ;;  %646 = vst [vmem:[%s1162_s7 + $0xb8] sm:$0xff] %v977_v29  ;;  %v524_v35 = vadd.f32 %v853_v32, %v1144_v24  ;;  %1002 = vtanh.f32 %v513_v30 }
 0x125   : > { %v515_v36 = vpop.f32.mrb[15].mxu0  ;;  %v579_v37 = vpop.f32.mrb[15].mxu1  ;;  %628 = vst [vmem:[%s1162_s7 + $0x28] sm:$0xff] %v979_v34  ;;  %v588_v39 = vadd.f32 %v869_v33, %v1144_v24  ;;  %1004 = vtanh.f32 %v577_v31 }
 0x126   : > { %v981_v38 = vpop.eup %980  ;;  %v516_v41 = vadd.f32 %v1144_v24, %v515_v36  ;;  %v580_v43 = vadd.f32 %v1144_v24, %v579_v37  ;;  %1006 = vtanh.f32 %v524_v35 }
 0x127   : > { %v983_v40 = vpop.eup %982  ;;  %644 = vst [vmem:[%s1162_s7 + $0xa8] sm:$0xff] %v981_v38  ;;  %1008 = vtanh.f32 %v588_v39 }
 0x128   : > { %v985_v42 = vpop.eup %984  ;;  %633 = vst [vmem:[%s1162_s7 + $0x50] sm:$0xff] %v983_v40  ;;  %1010 = vtanh.f32 %v516_v41 }
 0x129   : > { %v987_v44 = vpop.eup %986  ;;  %649 = vst [vmem:[%s1162_s7 + $0xd0] sm:$0xff] %v985_v42  ;;  %1012 = vtanh.f32 %v580_v43 }
 0x12a   : > { %v989_v45 = vpop.eup %988  ;;  %631 = vst [vmem:[%s1162_s7 + $0x40] sm:$0xff] %v987_v44 }
 0x12b   : > { %v991_v46 = vpop.eup %990  ;;  %647 = vst [vmem:[%s1162_s7 + $0xc0] sm:$0xff] %v989_v45 }
 0x12c   : > { %v993_v47 = vpop.eup %992  ;;  %634 = vst [vmem:[%s1162_s7 + $0x58] sm:$0xff] %v991_v46 }
 0x12d   : > { %v995_v24 = vpop.eup %994  ;;  %650 = vst [vmem:[%s1162_s7 + $0xd8] sm:$0xff] %v993_v47 }
 0x12e   : > { %v997_v48 = vpop.eup %996  ;;  %632 = vst [vmem:[%s1162_s7 + $0x48] sm:$0xff] %v995_v24 }
 0x12f   : > { %v999_v49 = vpop.eup %998  ;;  %648 = vst [vmem:[%s1162_s7 + $0xc8] sm:$0xff] %v997_v48 }
 0x130   : > { %v1001_v50 = vpop.eup %1000  ;;  %637 = vst [vmem:[%s1162_s7 + $0x70] sm:$0xff] %v999_v49 }
 0x131   : > { %v1003_v51 = vpop.eup %1002  ;;  %653 = vst [vmem:[%s1162_s7 + $0xf0] sm:$0xff] %v1001_v50 }
 0x132   : > { %v1005_v52 = vpop.eup %1004  ;;  %635 = vst [vmem:[%s1162_s7 + $0x60] sm:$0xff] %v1003_v51 }
 0x133   : > { %v1007_v53 = vpop.eup %1006  ;;  %651 = vst [vmem:[%s1162_s7 + $0xe0] sm:$0xff] %v1005_v52 }
 0x134   : > { %v1009_v54 = vpop.eup %1008  ;;  %638 = vst [vmem:[%s1162_s7 + $0x78] sm:$0xff] %v1007_v53 }
 0x135   : > { %v1011_v55 = vpop.eup %1010  ;;  %654 = vst [vmem:[%s1162_s7 + $0xf8] sm:$0xff] %v1009_v54 }
 0x136   : > { %v1013_v56 = vpop.eup %1012  ;;  %636 = vst [vmem:[%s1162_s7 + $0x68] sm:$0xff] %v1011_v55 }
 0x137   : > { %652 = vst [vmem:[%s1162_s7 + $0xe8] sm:$0xff] %v1013_v56 }
 0x138 PF: > { %s13_s16 = sadd.s32 1, %s1052_s16   ;;  %s1235_s12 = smov %s1044_s14 }
 0x139   : > { %p10_p7 = scmp.ge.s32.totalorder %s13_s16, 10   ;;  %s1236_s13 = smov %s1048_s15 }
 0x13a   : > { %s1237_s14 = smov %s1240_s17  ;;  %s1238_s15 = smov %s1244_s18 }
 0x13b   :  { %12 = sbr.rel (!%p10_p7) target bundleno = 3 (0x3), region = 65 }

</bundles_post_ra>
